<compile_context>
chip_gen: v7x
topology: tpu7x:2x2x1
jax: 0.10.0
libtpu: 0.0.40
codegen_flags: <defaults>
</compile_context>

<pallas_src>
import jax
import jax.numpy as jnp
from jax import lax
from jax.experimental import pallas as pl
from jax.experimental.pallas import tpu as pltpu

_EPS = 1e-12                       # torch.nn.functional.normalize default eps
_SMALL_INPUT_BYTES = 256 * 1024    # below this, fused XLA beats a kernel launch
_TARGET_TILE_BYTES = 1 << 20       # ~1 MiB input tiles: HBM-roofline sweet spot


def _l2_normalize_kernel(x_ref, o_ref):
    # One (tile_rows, D) block per grid step.  Reduce in f32, scale in the
    # input dtype (bf16 stays bf16 on the store path).
    x = x_ref[...]
    xf = x.astype(jnp.float32)
    sq = jnp.sum(xf * xf, axis=1, keepdims=True)          # (tile, 1) f32
    # rsqrt(max(sq, eps^2)) == 1 / max(||x||, eps)  (sqrt is monotone),
    # i.e. exactly torch's x / clamp_min(norm, eps), but on the EUP slot.
    inv = lax.rsqrt(jnp.maximum(sq, _EPS * _EPS))
    o_ref[...] = (x * inv.astype(x.dtype)).astype(o_ref.dtype)


def _round_up(a, m):
    return ((a + m - 1) // m) * m


def _l2_normalize_xla(x):
    """Fused-XLA fast path for tiny inputs (same math as the kernel)."""
    xf = x.astype(jnp.float32)
    sq = jnp.sum(xf * xf, axis=1, keepdims=True)
    inv = lax.rsqrt(jnp.maximum(sq, _EPS * _EPS))
    return (xf * inv).astype(x.dtype)


def l2_normalize(x):
    """Row-wise L2 normalization of a (B, D) array (F.normalize, p=2, dim=1)."""
    B, D = x.shape
    itemsize = jnp.dtype(x.dtype).itemsize

    # Tiny inputs: pallas_call dispatch + per-step overhead dominates; let XLA
    # fuse the elementwise + reduce instead.
    if B * D * itemsize <= _SMALL_INPUT_BYTES:
        return _l2_normalize_xla(x)

    # dtype sublane pack: 8 rows for f32, 16 for bf16, 32 for int8/fp8.
    sub = max(8, 32 // itemsize)
    row_bytes = D * itemsize

    # ~1 MiB input tiles -> many grid steps whenever B allows, so the pipeline
    # has a steady state and v7x's two TensorCores each get several steps.
    # 2x in + 2x out live tiles stay well under every chip's scoped VMEM.
    tile = (_TARGET_TILE_BYTES // row_bytes) // sub * sub
    tile = max(sub, min(tile, _round_up(B, sub)))

    grid = pl.cdiv(B, tile)  # ragged last block: OOB reads are garbage rows,
                             # OOB writes are masked -> no pad, no slice.

    return pl.pallas_call(
        _l2_normalize_kernel,
        out_shape=jax.ShapeDtypeStruct((B, D), x.dtype),
        grid=(grid,),
        in_specs=[pl.BlockSpec((tile, D), lambda i: (i, 0))],
        out_specs=pl.BlockSpec((tile, D), lambda i: (i, 0)),
        compiler_params=pltpu.CompilerParams(
            dimension_semantics=("parallel",),
        ),
    )(x)


class BaseMiner:
    """JAX/Pallas port of pytorch_metric_learning BaseMiner (abstract)."""

    def __init__(self, normalize_embeddings=True):
        self.normalize_embeddings = normalize_embeddings

    def mine(self, embeddings, labels, ref_emb, ref_labels):
        # TODO(synk): abstract in the reference module (NotImplementedError);
        # concrete subclasses (e.g. TripletMarginMiner) implement this and
        # should fuse the per-row rsqrt scaling into their distance matmul.
        raise NotImplementedError

    def output_assertion(self, output):
        # TODO(synk): abstract in the reference module.
        raise NotImplementedError

    def add_to_recordable_attributes(self, name=None, list_of_names=None):
        # TODO(synk): bookkeeping helper in the reference library; no compute.
        pass

    def set_ref_emb(self, embeddings, labels, ref_emb, ref_labels):
        if ref_emb is not None:
            if self.normalize_embeddings:
                ref_emb = l2_normalize(ref_emb)
            ref_labels = jnp.asarray(ref_labels)
        else:
            ref_emb, ref_labels = embeddings, labels
        return ref_emb, ref_labels

    def preprocess(self, embeddings, labels, ref_emb=None, ref_labels=None):
        """Everything forward() does before calling the abstract mine()."""
        labels = jnp.asarray(labels)
        if self.normalize_embeddings:
            embeddings = l2_normalize(embeddings)
        ref_emb, ref_labels = self.set_ref_emb(
            embeddings, labels, ref_emb, ref_labels
        )
        return embeddings, labels, ref_emb, ref_labels

    def forward(self, embeddings, labels, ref_emb=None, ref_labels=None):
        embeddings, labels, ref_emb, ref_labels = self.preprocess(
            embeddings, labels, ref_emb, ref_labels
        )
        mining_output = self.mine(embeddings, labels, ref_emb, ref_labels)
        self.output_assertion(mining_output)
        return mining_output

    __call__ = forward


if __name__ == "__main__":
    key = jax.random.PRNGKey(0)
    k1, k2, k3, k4, k5, k6 = jax.random.split(key, 6)

    # --- Small shapes typical of the module (fast XLA path). ---------------
    B, D = 16, 128          # batch_size, embedding_size
    RB = 8                  # ref batch size

    embeddings = jax.random.normal(k1, (B, D), dtype=jnp.float32)
    labels = jax.random.randint(k2, (B,), 0, 4, dtype=jnp.int32)
    ref_emb = jax.random.normal(k3, (RB, D), dtype=jnp.float32)
    ref_labels = jax.random.randint(k4, (RB,), 0, 4, dtype=jnp.int32)

    miner = BaseMiner(normalize_embeddings=True)

    # Case 1: no ref_emb -> ref defaults to (normalized) embeddings.
    emb_n, lab, r_emb, r_lab = miner.preprocess(embeddings, labels)

    # Case 2: explicit ref_emb -> both normalized.
    emb_n2, _, r_emb2, _ = miner.preprocess(
        embeddings, labels, ref_emb=ref_emb, ref_labels=ref_labels
    )
    jax.block_until_ready((emb_n, r_emb2))

    # --- Mid-size inputs that take the Pallas path. -------------------------
    # 4096 x 512 f32 = 8 MiB -> ~1 MiB tiles, 8 grid steps (tile-aligned).
    big = jax.random.normal(k5, (4096, 512), dtype=jnp.float32)
    big_n = l2_normalize(big)
    # 2051 x 512 f32 -> ragged last block (masked writes, no pad / no slice).
    ragged = jax.random.normal(k6, (2051, 512), dtype=jnp.float32)
    ragged_n = l2_normalize(ragged)
    jax.block_until_ready((big_n, ragged_n))

    # --- Correctness vs. plain-JAX reference of F.normalize semantics. ------
    def ref_normalize(x):
        n = jnp.sqrt(jnp.sum(x * x, axis=1, keepdims=True))
        return x / jnp.maximum(n, _EPS)

    assert jnp.allclose(emb_n, ref_normalize(embeddings), atol=1e-5, rtol=1e-5)
    assert jnp.allclose(r_emb, emb_n)  # default ref_emb == normalized embeddings
    assert jnp.allclose(r_emb2, ref_normalize(ref_emb), atol=1e-5, rtol=1e-5)
    assert jnp.allclose(big_n, ref_normalize(big), atol=1e-5, rtol=1e-5)
    assert jnp.allclose(ragged_n, ref_normalize(ragged), atol=1e-5, rtol=1e-5)
    assert jnp.allclose(
        jnp.sum(big_n * big_n, axis=1), jnp.ones((big.shape[0],)), atol=1e-4
    )

    print("KERNEL_OK")
</pallas_src>

<mosaic_0001>
module attributes {stable_mosaic.version = 11 : i64} {
  func.func @_l2_normalize_kernel(%arg0: i32, %arg1: memref<512x512xf32, #tpu.memory_space<vmem>>, %arg2: memref<512x512xf32, #tpu.memory_space<vmem>>) attributes {dimension_semantics = [#tpu.dimension_semantics<parallel>], iteration_bounds = array<i64: 8>, scalar_prefetch = 0 : i64, scratch_operands = 0 : i64, tpu.core_type = #tpu.core_type<tc>, window_params = [{transform_indices = @transform_0, window_bounds = array<i64: 512, 512>}, {transform_indices = @transform_1, window_bounds = array<i64: 512, 512>}]} {
    %c0 = arith.constant 0 : index
    %c0_0 = arith.constant 0 : index
    %0 = vector.load %arg1[%c0, %c0_0] : memref<512x512xf32, #tpu.memory_space<vmem>>, vector<512x512xf32>
    %1 = arith.mulf %0, %0 : vector<512x512xf32>
    %cst = arith.constant dense<0.000000e+00> : vector<512xf32>
    %2 = vector.multi_reduction <add>, %1, %cst [1] : vector<512x512xf32> to vector<512xf32>
    %3 = vector.shape_cast %2 : vector<512xf32> to vector<512x1xf32>
    %cst_1 = arith.constant 1.000000e-24 : f32
    %4 = vector.broadcast %cst_1 : f32 to vector<512x1xf32>
    %5 = arith.maximumf %3, %4 : vector<512x1xf32>
    %6 = math.rsqrt %5 : vector<512x1xf32>
    %7 = vector.broadcast %6 : vector<512x1xf32> to vector<512x512xf32>
    %8 = arith.mulf %0, %7 : vector<512x512xf32>
    %c0_2 = arith.constant 0 : index
    %c0_3 = arith.constant 0 : index
    %9 = vector.load %arg2[%c0_2, %c0_3] : memref<512x512xf32, #tpu.memory_space<vmem>>, vector<512x512xf32>
    tpu.vector_store %arg2[%c0_2, %c0_3], %8 {strides = array<i32>} : memref<512x512xf32, #tpu.memory_space<vmem>>, vector<512x512xf32>,
    return
  }
  func.func @transform_0(%arg0: i32) -> (i32, i32) {
    %c0_i32 = arith.constant 0 : i32
    %c0_i32_0 = arith.constant 0 : i32
    return %arg0, %c0_i32 : i32, i32
  }
  func.func @transform_1(%arg0: i32) -> (i32, i32) {
    %c0_i32 = arith.constant 0 : i32
    %c0_i32_0 = arith.constant 0 : i32
    return %arg0, %c0_i32 : i32, i32
  }
}

</mosaic_0001>

<bundles_post_ra>
// kernel: tpu_custom_call.1
= control target key start
LH: loop header
LB: loop body
LE: loop exit
PB: predicated region body
PF: predicated region fallthrough
CT: control target
= control target key end

     0   :  { %6 = vsyncpa [#allocation3], 0  ;;  %s3271_s0 = inlined_call_operand.hbm [shape: f32[4096,512], index: 0, kind: input, shape index: {}]   ;;  %s3272_s1 = inlined_call_operand.hbm [shape: f32[4096,512], index: 1, kind: output, shape index: {}]  }
   0x1   :  { %8 = vsyncpa [#allocation3 + $0x1], 0 }
   0x2   :  { %9 = vsyncpa [#allocation4], 0 }
   0x3   :  { %11 = vsyncpa [#allocation4 + $0x1], 0  ;;  %s2266_s6 = smov 0   ;;  %s2268_s7 = smov 0  }
   0x4   :  { %s2270_s8 = smov 0   ;;  %s2272_s9 = smov 0  }
   0x5 LB: > { %s2287_s10 = sadd.s32 4294967295, %s2248_s9   ;;  %s1698_s11 = sadd.s32 4294967294, %s2248_s9   ;;  %s2248_s9 = sphi %s2272_s9, %s3284_s9   ;;  %s2244_s8 = sphi %s2270_s8, %s3283_s8   ;;  %s2240_s7 = sphi %s2268_s7, %s3282_s7   ;;  %s2236_s6 = sphi %s2266_s6, %s3281_s6  }
   0x6   : > { %s2291_s12 = sadd.s32 1, %s2248_s9   ;;  %s24_s13 = sadd.s32 1, %s2244_s8 }
   0x7   : > { %s21_s14 = ssub.s32 %s2248_s9, %s2291_s12  ;;  %p31_p0 = scmp.ne.s32.totalorder %s2244_s8, %s2240_s7 }
   0x8   : > { %p22_p1 = scmp.eq.s32.totalorder %s21_s14, 0  ;;  %p32_p2 = scmp.eq.s32.totalorder %s2248_s9, 0 }
   0x9   : > { %p37_p3 = scmp.ne.s32.totalorder %s2240_s7, %s2236_s6  ;;  %p38_p4 = scmp.eq.s32.totalorder %s2287_s10, 0 }
   0xa   : > { %s2303_s15 = scalar_select %p22_p1, %s2244_s8, %s24_s13  }
   0xb   : > { %p2305_p5 = por %p32_p2, %p31_p0  ;;  %p2309_p6 = por %p38_p4, %p37_p3 }
   0xc   : > { %p61_p7 = scmp.eq.s32.totalorder %s2287_s10, 7  ;;  %p67_p8 = scmp.eq.s32.totalorder %s1698_s11, 7 }
   0xd   : > { %p1730_p9 = scmp.lt.s32.totalorder %s2248_s9, 8  ;;  %s87_s20 = sand.u32 1, %s2244_s8  }
   0xe   : > { %p2315_p10 = por %p61_p7, %p31_p0  ;;  %p2319_p11 = por %p67_p8, %p37_p3 }
   0xf   : > { %s1715_s21 = sshll.u32 %s2248_s9, 15  ;;  %s1701_s22 = sshll.u32 %s87_s20, 11 }
  0x10   : > { %s3276_s18 = scalar_select %p2315_p10, 1, 0 }
  0x11   : > { %s3277_s19 = scalar_select %p2319_p11, 1, 0 }
  0x12   : > { %s2328_s25 = scalar_lea.hbm %s3271_s0, %s1715_s21  ;;  %s91_s26 = scalar_lea.vmem [#allocation2], %s1701_s22 }
  0x13   : > { %s99_s27 = sshll.u32 %s91_s26, 4  ;;  %p2332_p12 = pnand %p1730_p9, %p2305_p5  ;;  %s2336_s27 = int_to_ptr.vmem [resolvable:$true] %s99_s27 }
  0x14   : > { %s2338_s29 = scalar_lea.sflag [#allocation3], %s87_s20  ;;  %s2152_s30 = scalar_lea.hbm %s2328_s25, 32768 }
  0x15   : > { %p2153_p13 = scmp.ne.s32.totalorder %s2328_s25, %s2152_s30  ;;  %p2154_p0 = pneg %p2332_p12 }
  0x16   : > { %s2157_s4 = scalar_lea.hbm %s3271_s0, 262144  ;;  %p2158_p3 = scmp.lt.u32.totalorder %s2328_s25, %s3271_s0 }
  0x17   : > { %p2155_p1 = pnand %p2154_p0, %p2153_p13  ;;  %p2159_p4 = scmp.lt.u32.totalorder %s2157_s4, %s2152_s30 }
  0x18   : > { %p2161_p7 = scmp.lt.u32.totalorder %s2152_s30, %s2328_s25 }
  0x19   : > { %p2156_p2 = pneg %p2155_p1  ;;  %p2160_p5 = por %p2159_p4, %p2158_p3 }
  0x1b   : > { %p2162_p8 = por %p2161_p7, %p2160_p5 }
  0x1d   : > { %p2163_p9 = pnand %p2162_p8, %p2156_p2 }
  0x1f   : > { %2166 = shalt.err (!%p2163_p9)
}
  0x20   : > { %s2167_s13 = scalar_lea.vmem %s2336_s27, 32768  ;;  %s2250_s14 = smov [#allocation2]  }
  0x21   : > { %p2168_p13 = scmp.ne.s32.totalorder %s2336_s27, %s2167_s13  ;;  %s2172_s16 = sshll.u32 %s2250_s14, 4  ;;  %s2173_s16 = int_to_ptr.vmem [resolvable:$false] %s2172_s16 }
  0x22   : > { %s2174_s20 = scalar_lea.vmem %s2173_s16, 65536  ;;  %p2175_p10 = scmp.lt.s32.totalorder %s2336_s27, %s2173_s16 }
  0x23   : > { %p2170_p1 = pnand %p2168_p13, %p2154_p0  ;;  %p2176_p3 = scmp.lt.s32.totalorder %s2174_s20, %s2167_s13 }
  0x25   : > { %p2171_p11 = pneg %p2170_p1  ;;  %p2177_p4 = por %p2176_p3, %p2175_p10 }
  0x27   : > { %p2178_p5 = pnand %p2177_p4, %p2171_p11 }
  0x29   : > { %2181 = shalt.err (!%p2178_p5)
}
  0x2a   : > { %s2251_s21 = smov 512   ;;  %s2252_s22 = smov 32  }
  0x2b   : > { %1725 = dma.hbm_to_vmem [thread:$0]  (!%p2332_p12), %s2328_s25, 32768, %s2336_s27, %s2338_s29, %s2251_s21, %s2251_s21, %s2252_s22  }
  0x2c   : > { %p1705_p0 = scmp.ge.s32.totalorder %s2248_s9, 1  ;;  %p107_p2 = scmp.lt.s32.totalorder %s2248_s9, 9 }
  0x2e   : > { %p108_p7 = pnand %p1705_p0, %p107_p2 }
  0x2f   : > { %s2369_s23 = sand.u32 (!%p108_p7), 1, %s2240_s7  }
  0x30   : > { %111 = sbr.rel (%p108_p7) target bundleno = 365 (0x16d), region = 24  ;;  %s1706_s24 = sshll.u32 (!%p108_p7), %s2369_s23, 11 }
  0x31   : > { %s114_s26 = scalar_lea.sflag (!%p108_p7), [#allocation3], %s2369_s23  ;;  %s2375_s30 = scalar_lea.vmem (!%p108_p7), [#allocation2], %s1706_s24 }
  0x37   : > { %2227 = dma.done.wait (%p2309_p6), %s114_s26, 32768  }
  0x38   : > { %2229 = vsyncadd (%p2309_p6), %s114_s26, 4294934528  ;;  %v146_v0 = vld [vmem:[%s2375_s30 + $0x40] sm:$0xff]  ;;  %v147_v1 = vld [vmem:[%s2375_s30 + $0x48] sm:$0xff]  ;;  %s2647_s17 = scalar_lea.vmem [#allocation5], %s1706_s24  ;;  %s1717_s25 = sshll.u32 %s2287_s10, 15 }
  0x39   : > { %v148_v2 = vld [vmem:[%s2375_s30 + $0x50] sm:$0xff]  ;;  %v149_v3 = vld [vmem:[%s2375_s30 + $0x58] sm:$0xff]  ;;  %v402_v4 = vmul.f32 %v146_v0, %v146_v0  ;;  %v403_v5 = vmul.f32 %v147_v1, %v147_v1  ;;  %v138_v7 = vld [vmem:[%s2375_s30] sm:$0xff]  ;;  %s1625_s27 = sshll.u32 %s2647_s17, 4  ;;  %s3212_s2 = scalar_lea.hbm %s3272_s1, %s1717_s25  ;;  %s3216_s27 = int_to_ptr.vmem [resolvable:$true] %s1625_s27 }
  0x3a   : > { %v404_v6 = vmul.f32 %v148_v2, %v148_v2  ;;  %v139_v8 = vld [vmem:[%s2375_s30 + $0x8] sm:$0xff]  ;;  %v405_v9 = vmul.f32 %v149_v3, %v149_v3  ;;  %v140_v10 = vld [vmem:[%s2375_s30 + $0x10] sm:$0xff]  ;;  %v141_v11 = vld [vmem:[%s2375_s30 + $0x18] sm:$0xff]  ;;  %v394_v12 = vmul.f32 %v138_v7, %v138_v7  ;;  %s1611_s10 = scalar_lea.sflag [#allocation4], %s2369_s23  ;;  %s2182_s3 = scalar_lea.vmem %s3216_s27, 32768 }
  0x3b   : > { %v395_v13 = vmul.f32 %v139_v8, %v139_v8  ;;  %v150_v14 = vld [vmem:[%s2375_s30 + $0x60] sm:$0xff]  ;;  %v660_v15 = vadd.f32 %v403_v5, %v402_v4  ;;  %v396_v16 = vmul.f32 %v140_v10, %v140_v10  ;;  %v397_v17 = vmul.f32 %v141_v11, %v141_v11  ;;  %v151_v18 = vld [vmem:[%s2375_s30 + $0x68] sm:$0xff]  ;;  %v152_v19 = vld [vmem:[%s2375_s30 + $0x70] sm:$0xff]  ;;  %p2183_p6 = scmp.ne.s32.totalorder %s3216_s27, %s2182_s3  ;;  %p3279_p10 = scmp.ne.s32.totalorder %s3276_s18, 0 }
  0x3c   : > { %v153_v20 = vld [vmem:[%s2375_s30 + $0x78] sm:$0xff]  ;;  %v406_v21 = vmul.f32 %v150_v14, %v150_v14  ;;  %v407_v23 = vmul.f32 %v151_v18, %v151_v18  ;;  %v408_v24 = vmul.f32 %v152_v19, %v152_v19  ;;  %v142_v26 = vld [vmem:[%s2375_s30 + $0x20] sm:$0xff]  ;;  %v143_v27 = vld [vmem:[%s2375_s30 + $0x28] sm:$0xff]  ;;  %s2253_s4 = smov [#allocation5]  }
  0x3d   : > { %v650_v22 = vadd.f32 %v395_v13, %v394_v12  ;;  %v409_v25 = vmul.f32 %v153_v20, %v153_v20  ;;  %v144_v28 = vld [vmem:[%s2375_s30 + $0x30] sm:$0xff]  ;;  %v661_v29 = vadd.f32 %v660_v15, %v404_v6  ;;  %v145_v30 = vld [vmem:[%s2375_s30 + $0x38] sm:$0xff]  ;;  %v398_v31 = vmul.f32 %v142_v26, %v142_v26  ;;  %v158_v34 = vld [vmem:[%s2375_s30 + $0xa0] sm:$0xff]  ;;  %p2184_p11 = pnand %p2183_p6, %p3279_p10  ;;  %s2186_s5 = sshll.u32 %s2253_s4, 4  ;;  %s2187_s5 = int_to_ptr.vmem [resolvable:$false] %s2186_s5 }
  0x3e   : > { %v399_v32 = vmul.f32 %v143_v27, %v143_v27  ;;  %v400_v33 = vmul.f32 %v144_v28, %v144_v28  ;;  %v159_v35 = vld [vmem:[%s2375_s30 + $0xa8] sm:$0xff]  ;;  %v665_v37 = vadd.f32 %v407_v23, %v406_v21  ;;  %v401_v38 = vmul.f32 %v145_v30, %v145_v30  ;;  %v160_v39 = vld [vmem:[%s2375_s30 + $0xb0] sm:$0xff]  ;;  %v161_v40 = vld [vmem:[%s2375_s30 + $0xb8] sm:$0xff]  ;;  %s2188_s11 = scalar_lea.vmem %s2187_s5, 65536  ;;  %p2189_p8 = scmp.lt.s32.totalorder %s3216_s27, %s2187_s5 }
  0x3f   : > { %v651_v36 = vadd.f32 %v650_v22, %v396_v16  ;;  %v414_v41 = vmul.f32 %v158_v34, %v158_v34  ;;  %v154_v42 = vld [vmem:[%s2375_s30 + $0x80] sm:$0xff]  ;;  %v662_v43 = vadd.f32 %v661_v29, %v405_v9  ;;  %v415_v45 = vmul.f32 %v159_v35, %v159_v35  ;;  %v155_v47 = vld [vmem:[%s2375_s30 + $0x88] sm:$0xff]  ;;  %v156_v48 = vld [vmem:[%s2375_s30 + $0x90] sm:$0xff]  ;;  %p2185_p12 = pneg %p2184_p11  ;;  %p2190_p9 = scmp.lt.s32.totalorder %s2188_s11, %s2182_s3 }
  0x40   : > { %v655_v44 = vadd.f32 %v399_v32, %v398_v31  ;;  %v416_v46 = vmul.f32 %v160_v39, %v160_v39  ;;  %v157_v49 = vld [vmem:[%s2375_s30 + $0x98] sm:$0xff]  ;;  %v666_v51 = vadd.f32 %v665_v37, %v408_v24  ;;  %v417_v52 = vmul.f32 %v161_v40, %v161_v40  ;;  %v166_v54 = vld [vmem:[%s2375_s30 + $0xe0] sm:$0xff]  ;;  %v167_v55 = vld [vmem:[%s2375_s30 + $0xe8] sm:$0xff] }
  0x41   : > { %v652_v50 = vadd.f32 %v651_v36, %v397_v17  ;;  %v410_v53 = vmul.f32 %v154_v42, %v154_v42  ;;  %v168_v56 = vld [vmem:[%s2375_s30 + $0xf0] sm:$0xff]  ;;  %663 = vadd.xlane.f32.xlu1 %v662_v43  ;;  %v675_v58 = vadd.f32 %v415_v45, %v414_v41  ;;  %v411_v59 = vmul.f32 %v155_v47, %v155_v47  ;;  %v169_v61 = vld [vmem:[%s2375_s30 + $0xf8] sm:$0xff]  ;;  %v162_v62 = vld [vmem:[%s2375_s30 + $0xc0] sm:$0xff]  ;;  %p2191_p13 = por %p2190_p9, %p2189_p8 }
  0x42   : > { %v656_v57 = vadd.f32 %v655_v44, %v400_v33  ;;  %v412_v60 = vmul.f32 %v156_v48, %v156_v48  ;;  %v163_v63 = vld [vmem:[%s2375_s30 + $0xc8] sm:$0xff]  ;;  %v667_v0 = vadd.f32 %v666_v51, %v409_v25  ;;  %v413_v1 = vmul.f32 %v157_v49, %v157_v49  ;;  %v164_v4 = vld [vmem:[%s2375_s30 + $0xd0] sm:$0xff]  ;;  %v165_v5 = vld [vmem:[%s2375_s30 + $0xd8] sm:$0xff] }
  0x43   : > { %653 = vadd.xlane.f32.xlu0 %v652_v50  ;;  %v422_v2 = vmul.f32 %v166_v54, %v166_v54  ;;  %v423_v3 = vmul.f32 %v167_v55, %v167_v55  ;;  %v676_v7 = vadd.f32 %v675_v58, %v416_v46  ;;  %v670_v8 = vadd.f32 %v411_v59, %v410_v53  ;;  %v174_v10 = vld [vmem:[%s2375_s30 + $0x120] sm:$0xff]  ;;  %v175_v11 = vld [vmem:[%s2375_s30 + $0x128] sm:$0xff]  ;;  %v176_v16 = vld [vmem:[%s2375_s30 + $0x130] sm:$0xff]  ;;  %p2192_p1 = pnand %p2191_p13, %p2185_p12 }
  0x44   : > { %v657_v6 = vadd.f32 %v656_v57, %v401_v38  ;;  %v424_v9 = vmul.f32 %v168_v56, %v168_v56  ;;  %v425_v12 = vmul.f32 %v169_v61, %v169_v61  ;;  %v418_v14 = vmul.f32 %v162_v62, %v162_v62  ;;  %v177_v17 = vld [vmem:[%s2375_s30 + $0x138] sm:$0xff]  ;;  %v170_v18 = vld [vmem:[%s2375_s30 + $0x100] sm:$0xff]  ;;  %v171_v23 = vld [vmem:[%s2375_s30 + $0x108] sm:$0xff] }
  0x45   : > { %v685_v13 = vadd.f32 %v423_v3, %v422_v2  ;;  %v419_v15 = vmul.f32 %v163_v63, %v163_v63  ;;  %668 = vadd.xlane.f32.xlu1 %v667_v0  ;;  %v677_v19 = vadd.f32 %v676_v7, %v417_v52  ;;  %v671_v20 = vadd.f32 %v670_v8, %v412_v60  ;;  %v172_v24 = vld [vmem:[%s2375_s30 + $0x110] sm:$0xff]  ;;  %v173_v29 = vld [vmem:[%s2375_s30 + $0x118] sm:$0xff]  ;;  %v182_v30 = vld [vmem:[%s2375_s30 + $0x160] sm:$0xff] }
  0x46   : > { %v420_v21 = vmul.f32 %v164_v4, %v164_v4  ;;  %v421_v22 = vmul.f32 %v165_v5, %v165_v5  ;;  %v430_v27 = vmul.f32 %v174_v10, %v174_v10  ;;  %v431_v28 = vmul.f32 %v175_v11, %v175_v11  ;;  %v183_v31 = vld [vmem:[%s2375_s30 + $0x168] sm:$0xff]  ;;  %v184_v36 = vld [vmem:[%s2375_s30 + $0x170] sm:$0xff]  ;;  %v178_v41 = vld [vmem:[%s2375_s30 + $0x140] sm:$0xff] }
  0x47   : > { %658 = vadd.xlane.f32.xlu0 %v657_v6  ;;  %v686_v25 = vadd.f32 %v685_v13, %v424_v9  ;;  %v680_v26 = vadd.f32 %v419_v15, %v418_v14  ;;  %v672_v32 = vadd.f32 %v671_v20, %v413_v1  ;;  %v432_v33 = vmul.f32 %v176_v16, %v176_v16  ;;  %v179_v42 = vld [vmem:[%s2375_s30 + $0x148] sm:$0xff]  ;;  %v185_v45 = vld [vmem:[%s2375_s30 + $0x178] sm:$0xff]  ;;  %v180_v48 = vld [vmem:[%s2375_s30 + $0x150] sm:$0xff] }
  0x48   : > { %v433_v34 = vmul.f32 %v177_v17, %v177_v17  ;;  %v426_v35 = vmul.f32 %v170_v18, %v170_v18  ;;  %v695_v39 = vadd.f32 %v431_v28, %v430_v27  ;;  %v427_v40 = vmul.f32 %v171_v23, %v171_v23  ;;  %v190_v53 = vld [vmem:[%s2375_s30 + $0x1a0] sm:$0xff]  ;;  %v191_v54 = vld [vmem:[%s2375_s30 + $0x1a8] sm:$0xff]  ;;  %v181_v56 = vld [vmem:[%s2375_s30 + $0x158] sm:$0xff] }
  0x49   : > { %v687_v37 = vadd.f32 %v686_v25, %v425_v12  ;;  %v681_v38 = vadd.f32 %v680_v26, %v420_v21  ;;  %678 = vadd.xlane.f32.xlu1 %v677_v19  ;;  %v428_v43 = vmul.f32 %v172_v24, %v172_v24  ;;  %v429_v44 = vmul.f32 %v173_v29, %v173_v29  ;;  %v192_v59 = vld [vmem:[%s2375_s30 + $0x1b0] sm:$0xff]  ;;  %v186_v60 = vld [vmem:[%s2375_s30 + $0x180] sm:$0xff]  ;;  %v193_v1 = vld [vmem:[%s2375_s30 + $0x1b8] sm:$0xff] }
  0x4a   : > { %v438_v46 = vmul.f32 %v182_v30, %v182_v30  ;;  %v439_v47 = vmul.f32 %v183_v31, %v183_v31  ;;  %v696_v50 = vadd.f32 %v695_v39, %v432_v33  ;;  %v690_v51 = vadd.f32 %v427_v40, %v426_v35  ;;  %v187_v2 = vld [vmem:[%s2375_s30 + $0x188] sm:$0xff]  ;;  %v188_v7 = vld [vmem:[%s2375_s30 + $0x190] sm:$0xff]  ;;  %v198_v8 = vld [vmem:[%s2375_s30 + $0x1e0] sm:$0xff] }
  0x4b   : > { %673 = vadd.xlane.f32.xlu0 %v672_v32  ;;  %v682_v49 = vadd.f32 %v681_v38, %v421_v22  ;;  %v440_v52 = vmul.f32 %v184_v36, %v184_v36  ;;  %v434_v57 = vmul.f32 %v178_v41, %v178_v41  ;;  %v435_v58 = vmul.f32 %v179_v42, %v179_v42  ;;  %v199_v9 = vld [vmem:[%s2375_s30 + $0x1e8] sm:$0xff]  ;;  %v189_v13 = vld [vmem:[%s2375_s30 + $0x198] sm:$0xff]  ;;  %v200_v15 = vld [vmem:[%s2375_s30 + $0x1f0] sm:$0xff] }
  0x4c   : > { %v705_v55 = vadd.f32 %v439_v47, %v438_v46  ;;  %v697_v61 = vadd.f32 %v696_v50, %v433_v34  ;;  %v691_v62 = vadd.f32 %v690_v51, %v428_v43  ;;  %v441_v63 = vmul.f32 %v185_v45, %v185_v45  ;;  %v194_v20 = vld [vmem:[%s2375_s30 + $0x1c0] sm:$0xff]  ;;  %v195_v21 = vld [vmem:[%s2375_s30 + $0x1c8] sm:$0xff]  ;;  %v201_v24 = vld [vmem:[%s2375_s30 + $0x1f8] sm:$0xff] }
  0x4d   : > { %v436_v0 = vmul.f32 %v180_v48, %v180_v48  ;;  %688 = vadd.xlane.f32.xlu1 %v687_v37  ;;  %v700_v4 = vadd.f32 %v435_v58, %v434_v57  ;;  %v446_v5 = vmul.f32 %v190_v53, %v190_v53  ;;  %v447_v6 = vmul.f32 %v191_v54, %v191_v54  ;;  %v196_v27 = vld [vmem:[%s2375_s30 + $0x1d0] sm:$0xff]  ;;  %v206_v32 = vld [vmem:[%s2375_s30 + $0x220] sm:$0xff]  ;;  %v207_v33 = vld [vmem:[%s2375_s30 + $0x228] sm:$0xff] }
  0x4e   : > { %v706_v3 = vadd.f32 %v705_v55, %v440_v52  ;;  %v692_v10 = vadd.f32 %v691_v62, %v429_v44  ;;  %v437_v11 = vmul.f32 %v181_v56, %v181_v56  ;;  %v448_v12 = vmul.f32 %v192_v59, %v192_v59  ;;  %v197_v36 = vld [vmem:[%s2375_s30 + $0x1d8] sm:$0xff]  ;;  %v208_v39 = vld [vmem:[%s2375_s30 + $0x230] sm:$0xff]  ;;  %v202_v40 = vld [vmem:[%s2375_s30 + $0x200] sm:$0xff] }
  0x4f   : > { %683 = vadd.xlane.f32.xlu0 %v682_v49  ;;  %v442_v14 = vmul.f32 %v186_v60, %v186_v60  ;;  %v701_v16 = vadd.f32 %v700_v4, %v436_v0  ;;  %v449_v17 = vmul.f32 %v193_v1, %v193_v1  ;;  %v715_v18 = vadd.f32 %v447_v6, %v446_v5  ;;  %v203_v44 = vld [vmem:[%s2375_s30 + $0x208] sm:$0xff]  ;;  %v204_v49 = vld [vmem:[%s2375_s30 + $0x210] sm:$0xff]  ;;  %v214_v50 = vld [vmem:[%s2375_s30 + $0x260] sm:$0xff] }
  0x50   : > { %v443_v19 = vmul.f32 %v187_v2, %v187_v2  ;;  %v707_v22 = vadd.f32 %v706_v3, %v441_v63  ;;  %v444_v23 = vmul.f32 %v188_v7, %v188_v7  ;;  %v454_v25 = vmul.f32 %v198_v8, %v198_v8  ;;  %v215_v51 = vld [vmem:[%s2375_s30 + $0x268] sm:$0xff]  ;;  %v209_v54 = vld [vmem:[%s2375_s30 + $0x238] sm:$0xff]  ;;  %v210_v62 = vld [vmem:[%s2375_s30 + $0x240] sm:$0xff] }
  0x51   : > { %v455_v26 = vmul.f32 %v199_v9, %v199_v9  ;;  %698 = vadd.xlane.f32.xlu1 %v697_v61  ;;  %v716_v28 = vadd.f32 %v715_v18, %v448_v12  ;;  %v445_v29 = vmul.f32 %v189_v13, %v189_v13  ;;  %v456_v31 = vmul.f32 %v200_v15, %v200_v15  ;;  %v216_v61 = vld [vmem:[%s2375_s30 + $0x270] sm:$0xff]  ;;  %v211_v63 = vld [vmem:[%s2375_s30 + $0x248] sm:$0xff]  ;;  %v205_v0 = vld [vmem:[%s2375_s30 + $0x218] sm:$0xff] }
  0x52   : > { %v710_v30 = vadd.f32 %v443_v19, %v442_v14  ;;  %v702_v34 = vadd.f32 %v701_v16, %v437_v11  ;;  %v450_v37 = vmul.f32 %v194_v20, %v194_v20  ;;  %v451_v38 = vmul.f32 %v195_v21, %v195_v21  ;;  %v212_v4 = vld [vmem:[%s2375_s30 + $0x250] sm:$0xff]  ;;  %v217_v9 = vld [vmem:[%s2375_s30 + $0x278] sm:$0xff]  ;;  %v223_v11 = vld [vmem:[%s2375_s30 + $0x2a8] sm:$0xff] }
  0x53   : > { %693 = vadd.xlane.f32.xlu0 %v692_v10  ;;  %v725_v35 = vadd.f32 %v455_v26, %v454_v25  ;;  %v457_v42 = vmul.f32 %v201_v24, %v201_v24  ;;  %v452_v43 = vmul.f32 %v196_v27, %v196_v27  ;;  %v462_v47 = vmul.f32 %v206_v32, %v206_v32  ;;  %v222_v10 = vld [vmem:[%s2375_s30 + $0x2a0] sm:$0xff]  ;;  %v213_v14 = vld [vmem:[%s2375_s30 + $0x258] sm:$0xff] }
  0x54   : > { %v711_v41 = vadd.f32 %v710_v30, %v444_v23  ;;  %v720_v46 = vadd.f32 %v451_v38, %v450_v37  ;;  %v463_v48 = vmul.f32 %v207_v33, %v207_v33  ;;  %v717_v52 = vadd.f32 %v716_v28, %v449_v17  ;;  %v224_v17 = vld [vmem:[%s2375_s30 + $0x2b0] sm:$0xff]  ;;  %v218_v18 = vld [vmem:[%s2375_s30 + $0x280] sm:$0xff]  ;;  %v219_v23 = vld [vmem:[%s2375_s30 + $0x288] sm:$0xff] }
  0x55   : > { %v726_v45 = vadd.f32 %v725_v35, %v456_v31  ;;  %708 = vadd.xlane.f32.xlu1 %v707_v22  ;;  %v453_v53 = vmul.f32 %v197_v36, %v197_v36  ;;  %v464_v55 = vmul.f32 %v208_v39, %v208_v39  ;;  %v458_v56 = vmul.f32 %v202_v40, %v202_v40  ;;  %v220_v28 = vld [vmem:[%s2375_s30 + $0x290] sm:$0xff]  ;;  %v231_v30 = vld [vmem:[%s2375_s30 + $0x2e8] sm:$0xff]  ;;  %v225_v33 = vld [vmem:[%s2375_s30 + $0x2b8] sm:$0xff] }
  0x56   : > { %v712_v57 = vadd.f32 %v711_v41, %v445_v29  ;;  %v721_v58 = vadd.f32 %v720_v46, %v452_v43  ;;  %v735_v59 = vadd.f32 %v463_v48, %v462_v47  ;;  %v459_v60 = vmul.f32 %v203_v44, %v203_v44  ;;  %v230_v29 = vld [vmem:[%s2375_s30 + $0x2e0] sm:$0xff]  ;;  %v232_v36 = vld [vmem:[%s2375_s30 + $0x2f0] sm:$0xff]  ;;  %v221_v44 = vld [vmem:[%s2375_s30 + $0x298] sm:$0xff] }
  0x57   : > { %703 = vadd.xlane.f32.xlu0 %v702_v34  ;;  %v460_v1 = vmul.f32 %v204_v49, %v204_v49  ;;  %v470_v2 = vmul.f32 %v214_v50, %v214_v50  ;;  %v471_v3 = vmul.f32 %v215_v51, %v215_v51  ;;  %v727_v5 = vadd.f32 %v726_v45, %v457_v42  ;;  %v226_v41 = vld [vmem:[%s2375_s30 + $0x2c0] sm:$0xff]  ;;  %v227_v42 = vld [vmem:[%s2375_s30 + $0x2c8] sm:$0xff]  ;;  %v228_v51 = vld [vmem:[%s2375_s30 + $0x2d0] sm:$0xff] }
  0x58   : > { %v465_v6 = vmul.f32 %v209_v54, %v209_v54  ;;  %v736_v7 = vadd.f32 %v735_v59, %v464_v55  ;;  %v730_v8 = vadd.f32 %v459_v60, %v458_v56  ;;  %v472_v12 = vmul.f32 %v216_v61, %v216_v61  ;;  %v233_v55 = vld [vmem:[%s2375_s30 + $0x2f8] sm:$0xff]  ;;  %v240_v59 = vld [vmem:[%s2375_s30 + $0x330] sm:$0xff]  ;;  %v234_v60 = vld [vmem:[%s2375_s30 + $0x300] sm:$0xff] }
  0x59   : > { %718 = vadd.xlane.f32.xlu1 %v717_v52  ;;  %v745_v13 = vadd.f32 %v471_v3, %v470_v2  ;;  %v466_v15 = vmul.f32 %v210_v62, %v210_v62  ;;  %v467_v16 = vmul.f32 %v211_v63, %v211_v63  ;;  %v722_v19 = vadd.f32 %v721_v58, %v453_v53  ;;  %v238_v52 = vld [vmem:[%s2375_s30 + $0x320] sm:$0xff]  ;;  %v239_v53 = vld [vmem:[%s2375_s30 + $0x328] sm:$0xff] }
  0x5a   : > { %v461_v20 = vmul.f32 %v205_v0, %v205_v0  ;;  %v731_v21 = vadd.f32 %v730_v8, %v460_v1  ;;  %v468_v22 = vmul.f32 %v212_v4, %v212_v4  ;;  %v473_v24 = vmul.f32 %v217_v9, %v217_v9  ;;  %v229_v1 = vld [vmem:[%s2375_s30 + $0x2d8] sm:$0xff]  ;;  %v235_v2 = vld [vmem:[%s2375_s30 + $0x308] sm:$0xff]  ;;  %v246_v8 = vld [vmem:[%s2375_s30 + $0x360] sm:$0xff] }
  0x5b   : > { %713 = vadd.xlane.f32.xlu0 %v712_v57  ;;  %v740_v25 = vadd.f32 %v467_v16, %v466_v15  ;;  %v478_v26 = vmul.f32 %v222_v10, %v222_v10  ;;  %v479_v27 = vmul.f32 %v223_v11, %v223_v11  ;;  %v737_v31 = vadd.f32 %v736_v7, %v465_v6  ;;  %v236_v7 = vld [vmem:[%s2375_s30 + $0x310] sm:$0xff]  ;;  %v247_v9 = vld [vmem:[%s2375_s30 + $0x368] sm:$0xff] }
  0x5c   : > { %v469_v32 = vmul.f32 %v213_v14, %v213_v14  ;;  %v480_v34 = vmul.f32 %v224_v17, %v224_v17  ;;  %v474_v35 = vmul.f32 %v218_v18, %v218_v18  ;;  %v746_v37 = vadd.f32 %v745_v13, %v472_v12  ;;  %v241_v12 = vld [vmem:[%s2375_s30 + $0x338] sm:$0xff]  ;;  %v242_v18 = vld [vmem:[%s2375_s30 + $0x340] sm:$0xff] }
  0x5d   : > { %728 = vadd.xlane.f32.xlu1 %v727_v5  ;;  %v741_v38 = vadd.f32 %v740_v25, %v468_v22  ;;  %v755_v39 = vadd.f32 %v479_v27, %v478_v26  ;;  %v475_v40 = vmul.f32 %v219_v23, %v219_v23  ;;  %v732_v43 = vadd.f32 %v731_v21, %v461_v20  ;;  %v237_v21 = vld [vmem:[%s2375_s30 + $0x318] sm:$0xff]  ;;  %v248_v23 = vld [vmem:[%s2375_s30 + $0x370] sm:$0xff] }
  0x5e   : > { %v476_v45 = vmul.f32 %v220_v28, %v220_v28  ;;  %v486_v46 = vmul.f32 %v230_v29, %v230_v29  ;;  %v487_v47 = vmul.f32 %v231_v30, %v231_v30  ;;  %v481_v48 = vmul.f32 %v225_v33, %v225_v33  ;;  %v244_v30 = vld [vmem:[%s2375_s30 + $0x350] sm:$0xff] }
  0x5f   : > { %723 = vadd.xlane.f32.xlu0 %v722_v19  ;;  %v750_v49 = vadd.f32 %v475_v40, %v474_v35  ;;  %v488_v50 = vmul.f32 %v232_v36, %v232_v36  ;;  %v756_v54 = vadd.f32 %v755_v39, %v480_v34  ;;  %v482_v57 = vmul.f32 %v226_v41, %v226_v41  ;;  %v243_v19 = vld [vmem:[%s2375_s30 + $0x348] sm:$0xff]  ;;  %v249_v40 = vld [vmem:[%s2375_s30 + $0x378] sm:$0xff] }
  0x60   : > { %v765_v56 = vadd.f32 %v487_v47, %v486_v46  ;;  %v483_v58 = vmul.f32 %v227_v42, %v227_v42  ;;  %v747_v61 = vadd.f32 %v746_v37, %v473_v24  ;;  %v742_v62 = vadd.f32 %v741_v38, %v469_v32  ;;  %v255_v32 = vld [vmem:[%s2375_s30 + $0x3a8] sm:$0xff]  ;;  %v250_v37 = vld [vmem:[%s2375_s30 + $0x380] sm:$0xff] }
  0x61   : > { %738 = vadd.xlane.f32.xlu1 %v737_v31  ;;  %v477_v63 = vmul.f32 %v221_v44, %v221_v44  ;;  %v751_v0 = vadd.f32 %v750_v49, %v476_v45  ;;  %v484_v3 = vmul.f32 %v228_v51, %v228_v51  ;;  %v494_v5 = vmul.f32 %v238_v52, %v238_v52  ;;  %v254_v31 = vld [vmem:[%s2375_s30 + $0x3a0] sm:$0xff]  ;;  %v245_v44 = vld [vmem:[%s2375_s30 + $0x358] sm:$0xff]  ;;  %v256_v52 = vld [vmem:[%s2375_s30 + $0x3b0] sm:$0xff] }
  0x62   : > { %v760_v4 = vadd.f32 %v483_v58, %v482_v57  ;;  %v495_v6 = vmul.f32 %v239_v53, %v239_v53  ;;  %v489_v10 = vmul.f32 %v233_v55, %v233_v55  ;;  %v766_v11 = vadd.f32 %v765_v56, %v488_v50  ;;  %v262_v49 = vld [vmem:[%s2375_s30 + $0x3e0] sm:$0xff]  ;;  %v263_v50 = vld [vmem:[%s2375_s30 + $0x3e8] sm:$0xff]  ;;  %v252_v56 = vld [vmem:[%s2375_s30 + $0x390] sm:$0xff] }
  0x63   : > { %733 = vadd.xlane.f32.xlu0 %v732_v43  ;;  %v496_v13 = vmul.f32 %v240_v59, %v240_v59  ;;  %v490_v14 = vmul.f32 %v234_v60, %v234_v60  ;;  %v757_v15 = vadd.f32 %v756_v54, %v481_v48  ;;  %v491_v17 = vmul.f32 %v235_v2, %v235_v2  ;;  %v251_v43 = vld [vmem:[%s2375_s30 + $0x388] sm:$0xff]  ;;  %v258_v58 = vld [vmem:[%s2375_s30 + $0x3c0] sm:$0xff] }
  0x64   : > { %v775_v16 = vadd.f32 %v495_v6, %v494_v5  ;;  %v485_v20 = vmul.f32 %v229_v1, %v229_v1  ;;  %v492_v22 = vmul.f32 %v236_v7, %v236_v7  ;;  %v502_v24 = vmul.f32 %v246_v8, %v246_v8  ;;  %v259_v59 = vld [vmem:[%s2375_s30 + $0x3c8] sm:$0xff]  ;;  %v270_v6 = vld [vmem:[%s2375_s30 + $0x420] sm:$0xff]  ;;  %v253_v8 = vld [vmem:[%s2375_s30 + $0x398] sm:$0xff] }
  0x65   : > { %748 = vadd.xlane.f32.xlu1 %v747_v61  ;;  %v503_v25 = vmul.f32 %v247_v9, %v247_v9  ;;  %v752_v26 = vadd.f32 %v751_v0, %v477_v63  ;;  %v761_v27 = vadd.f32 %v760_v4, %v484_v3  ;;  %v497_v28 = vmul.f32 %v241_v12, %v241_v12  ;;  %v257_v3 = vld [vmem:[%s2375_s30 + $0x3b8] sm:$0xff]  ;;  %v271_v7 = vld [vmem:[%s2375_s30 + $0x428] sm:$0xff] }
  0x66   : > { %v770_v29 = vadd.f32 %v491_v17, %v490_v14  ;;  %v767_v33 = vadd.f32 %v766_v11, %v489_v10  ;;  %v776_v34 = vadd.f32 %v775_v16, %v496_v13  ;;  %v498_v35 = vmul.f32 %v242_v18, %v242_v18  ;;  %v266_v13 = vld [vmem:[%s2375_s30 + $0x400] sm:$0xff]  ;;  %v260_v16 = vld [vmem:[%s2375_s30 + $0x3d0] sm:$0xff]  ;;  %v267_v17 = vld [vmem:[%s2375_s30 + $0x408] sm:$0xff] }
  0x67   : > { %743 = vadd.xlane.f32.xlu0 %v742_v62  ;;  %v499_v36 = vmul.f32 %v243_v19, %v243_v19  ;;  %v493_v38 = vmul.f32 %v237_v21, %v237_v21  ;;  %v504_v41 = vmul.f32 %v248_v23, %v248_v23  ;;  %v785_v42 = vadd.f32 %v503_v25, %v502_v24  ;;  %v264_v62 = vld [vmem:[%s2375_s30 + $0x3f0] sm:$0xff] }
  0x68   : > { %v771_v39 = vadd.f32 %v770_v29, %v492_v22  ;;  %v500_v45 = vmul.f32 %v244_v30, %v244_v30  ;;  %v510_v47 = vmul.f32 %v254_v31, %v254_v31  ;;  %v511_v48 = vmul.f32 %v255_v32, %v255_v32  ;;  %v272_v21 = vld [vmem:[%s2375_s30 + $0x430] sm:$0xff]  ;;  %v278_v29 = vld [vmem:[%s2375_s30 + $0x460] sm:$0xff]  ;;  %v279_v30 = vld [vmem:[%s2375_s30 + $0x468] sm:$0xff] }
  0x69   : > { %758 = vadd.xlane.f32.xlu1 %v757_v15  ;;  %v780_v46 = vadd.f32 %v499_v36, %v498_v35  ;;  %v762_v51 = vadd.f32 %v761_v27, %v485_v20  ;;  %v506_v53 = vmul.f32 %v250_v37, %v250_v37  ;;  %v777_v54 = vadd.f32 %v776_v34, %v497_v28  ;;  %v265_v20 = vld [vmem:[%s2375_s30 + $0x3f8] sm:$0xff]  ;;  %v268_v27 = vld [vmem:[%s2375_s30 + $0x410] sm:$0xff]  ;;  %v274_v35 = vld [vmem:[%s2375_s30 + $0x440] sm:$0xff] }
  0x6a   : > { %v505_v55 = vmul.f32 %v249_v40, %v249_v40  ;;  %v507_v57 = vmul.f32 %v251_v43, %v251_v43  ;;  %v786_v60 = vadd.f32 %v785_v42, %v504_v41  ;;  %v501_v61 = vmul.f32 %v245_v44, %v245_v44  ;;  %v275_v36 = vld [vmem:[%s2375_s30 + $0x448] sm:$0xff]  ;;  %v273_v42 = vld [vmem:[%s2375_s30 + $0x438] sm:$0xff] }
  0x6b   : > { %753 = vadd.xlane.f32.xlu0 %v752_v26  ;;  %v518_v63 = vmul.f32 %v262_v49, %v262_v49  ;;  %v519_v0 = vmul.f32 %v263_v50, %v263_v50  ;;  %v772_v1 = vadd.f32 %v771_v39, %v493_v38  ;;  %v781_v2 = vadd.f32 %v780_v46, %v500_v45  ;;  %v261_v39 = vld [vmem:[%s2375_s30 + $0x3d8] sm:$0xff]  ;;  %v280_v49 = vld [vmem:[%s2375_s30 + $0x470] sm:$0xff] }
  0x6c   : > { %v512_v4 = vmul.f32 %v256_v52, %v256_v52  ;;  %v795_v5 = vadd.f32 %v511_v48, %v510_v47  ;;  %v508_v9 = vmul.f32 %v252_v56, %v252_v56  ;;  %v790_v10 = vadd.f32 %v507_v57, %v506_v53  ;;  %v269_v43 = vld [vmem:[%s2375_s30 + $0x418] sm:$0xff]  ;;  %v286_v56 = vld [vmem:[%s2375_s30 + $0x4a0] sm:$0xff]  ;;  %v287_v57 = vld [vmem:[%s2375_s30 + $0x4a8] sm:$0xff] }
  0x6d   : > { %768 = vadd.xlane.f32.xlu1 %v767_v33  ;;  %v514_v11 = vmul.f32 %v258_v58, %v258_v58  ;;  %v515_v12 = vmul.f32 %v259_v59, %v259_v59  ;;  %v520_v14 = vmul.f32 %v264_v62, %v264_v62  ;;  %v805_v15 = vadd.f32 %v519_v0, %v518_v63  ;;  %v283_v62 = vld [vmem:[%s2375_s30 + $0x488] sm:$0xff] }
  0x6e   : > { %v787_v18 = vadd.f32 %v786_v60, %v505_v55  ;;  %v513_v19 = vmul.f32 %v257_v3, %v257_v3  ;;  %v526_v22 = vmul.f32 %v270_v6, %v270_v6  ;;  %v527_v23 = vmul.f32 %v271_v7, %v271_v7  ;;  %v276_v55 = vld [vmem:[%s2375_s30 + $0x450] sm:$0xff]  ;;  %v294_v3 = vld [vmem:[%s2375_s30 + $0x4e0] sm:$0xff]  ;;  %v277_v6 = vld [vmem:[%s2375_s30 + $0x458] sm:$0xff] }
  0x6f   : > { %763 = vadd.xlane.f32.xlu0 %v762_v51  ;;  %v782_v24 = vadd.f32 %v781_v2, %v501_v61  ;;  %v796_v25 = vadd.f32 %v795_v5, %v512_v4  ;;  %v509_v26 = vmul.f32 %v253_v8, %v253_v8  ;;  %v522_v28 = vmul.f32 %v266_v13, %v266_v13  ;;  %v282_v61 = vld [vmem:[%s2375_s30 + $0x480] sm:$0xff]  ;;  %v295_v4 = vld [vmem:[%s2375_s30 + $0x4e8] sm:$0xff]  ;;  %v281_v5 = vld [vmem:[%s2375_s30 + $0x478] sm:$0xff] }
  0x70   : > { %v791_v31 = vadd.f32 %v790_v10, %v508_v9  ;;  %v516_v32 = vmul.f32 %v260_v16, %v260_v16  ;;  %v800_v33 = vadd.f32 %v515_v12, %v514_v11  ;;  %v523_v34 = vmul.f32 %v267_v17, %v267_v17  ;;  %v288_v12 = vld [vmem:[%s2375_s30 + $0x4b0] sm:$0xff] }
  0x71   : > { %778 = vadd.xlane.f32.xlu1 %v777_v54  ;;  %v521_v37 = vmul.f32 %v265_v20, %v265_v20  ;;  %v806_v38 = vadd.f32 %v805_v15, %v520_v14  ;;  %v528_v40 = vmul.f32 %v272_v21, %v272_v21  ;;  %v815_v41 = vadd.f32 %v527_v23, %v526_v22  ;;  %v284_v15 = vld [vmem:[%s2375_s30 + $0x490] sm:$0xff] }
  0x72   : > { %v524_v44 = vmul.f32 %v268_v27, %v268_v27  ;;  %v810_v45 = vadd.f32 %v523_v34, %v522_v28  ;;  %v534_v46 = vmul.f32 %v278_v29, %v278_v29  ;;  %v535_v47 = vmul.f32 %v279_v30, %v279_v30  ;;  %v285_v34 = vld [vmem:[%s2375_s30 + $0x498] sm:$0xff] }
  0x73   : > { %773 = vadd.xlane.f32.xlu0 %v772_v1  ;;  %v797_v48 = vadd.f32 %v796_v25, %v513_v19  ;;  %v530_v50 = vmul.f32 %v274_v35, %v274_v35  ;;  %v531_v51 = vmul.f32 %v275_v36, %v275_v36  ;;  %v792_v52 = vadd.f32 %v791_v31, %v509_v26  ;;  %v291_v19 = vld [vmem:[%s2375_s30 + $0x4c8] sm:$0xff]  ;;  %v302_v25 = vld [vmem:[%s2375_s30 + $0x520] sm:$0xff] }
  0x74   : > { %v517_v53 = vmul.f32 %v261_v39, %v261_v39  ;;  %v801_v54 = vadd.f32 %v800_v33, %v516_v32  ;;  %v807_v58 = vadd.f32 %v806_v38, %v521_v37  ;;  %v529_v59 = vmul.f32 %v273_v42, %v273_v42  ;;  %v303_v26 = vld [vmem:[%s2375_s30 + $0x528] sm:$0xff]  ;;  %v298_v31 = vld [vmem:[%s2375_s30 + $0x500] sm:$0xff]  ;;  %v289_v33 = vld [vmem:[%s2375_s30 + $0x4b8] sm:$0xff] }
  0x75   : > { %788 = vadd.xlane.f32.xlu1 %v787_v18  ;;  %v525_v60 = vmul.f32 %v269_v43, %v269_v43  ;;  %v816_v63 = vadd.f32 %v815_v41, %v528_v40  ;;  %v811_v0 = vadd.f32 %v810_v45, %v524_v44  ;;  %v536_v1 = vmul.f32 %v280_v49, %v280_v49  ;;  %v290_v18 = vld [vmem:[%s2375_s30 + $0x4c0] sm:$0xff]  ;;  %v299_v32 = vld [vmem:[%s2375_s30 + $0x508] sm:$0xff]  ;;  %v292_v41 = vld [vmem:[%s2375_s30 + $0x4d0] sm:$0xff] }
  0x76   : > { %v825_v2 = vadd.f32 %v535_v47, %v534_v46  ;;  %v532_v7 = vmul.f32 %v276_v55, %v276_v55  ;;  %v820_v8 = vadd.f32 %v531_v51, %v530_v50  ;;  %v542_v9 = vmul.f32 %v286_v56, %v286_v56  ;;  %v297_v44 = vld [vmem:[%s2375_s30 + $0x4f8] sm:$0xff]  ;;  %v304_v45 = vld [vmem:[%s2375_s30 + $0x530] sm:$0xff] }
  0x77   : > { %783 = vadd.xlane.f32.xlu0 %v782_v24  ;;  %v543_v10 = vmul.f32 %v287_v57, %v287_v57  ;;  %v802_v11 = vadd.f32 %v801_v54, %v517_v53  ;;  %v538_v13 = vmul.f32 %v282_v61, %v282_v61  ;;  %v539_v14 = vmul.f32 %v283_v62, %v283_v62  ;;  %v296_v24 = vld [vmem:[%s2375_s30 + $0x4f0] sm:$0xff]  ;;  %v310_v53 = vld [vmem:[%s2375_s30 + $0x560] sm:$0xff]  ;;  %v311_v54 = vld [vmem:[%s2375_s30 + $0x568] sm:$0xff] }
  0x78   : > { %v550_v16 = vmul.f32 %v294_v3, %v294_v3  ;;  %v551_v17 = vmul.f32 %v295_v4, %v295_v4  ;;  %v817_v20 = vadd.f32 %v816_v63, %v529_v59  ;;  %v537_v21 = vmul.f32 %v281_v5, %v281_v5  ;;  %v306_v59 = vld [vmem:[%s2375_s30 + $0x540] sm:$0xff]  ;;  %v293_v63 = vld [vmem:[%s2375_s30 + $0x4d8] sm:$0xff] }
  0x79   : > { %798 = vadd.xlane.f32.xlu1 %v797_v48  ;;  %v826_v22 = vadd.f32 %v825_v2, %v536_v1  ;;  %v533_v23 = vmul.f32 %v277_v6, %v277_v6  ;;  %v812_v27 = vadd.f32 %v811_v0, %v525_v60  ;;  %v821_v28 = vadd.f32 %v820_v8, %v532_v7  ;;  %v307_v60 = vld [vmem:[%s2375_s30 + $0x548] sm:$0xff]  ;;  %v305_v2 = vld [vmem:[%s2375_s30 + $0x538] sm:$0xff] }
  0x7a   : > { %v544_v29 = vmul.f32 %v288_v12, %v288_v12  ;;  %v835_v30 = vadd.f32 %v543_v10, %v542_v9  ;;  %v540_v35 = vmul.f32 %v284_v15, %v284_v15  ;;  %v830_v36 = vadd.f32 %v539_v14, %v538_v13  ;;  %v301_v3 = vld [vmem:[%s2375_s30 + $0x518] sm:$0xff]  ;;  %v312_v9 = vld [vmem:[%s2375_s30 + $0x570] sm:$0xff] }
  0x7b   : > { %793 = vadd.xlane.f32.xlu0 %v792_v52  ;;  %v546_v37 = vmul.f32 %v290_v18, %v290_v18  ;;  %v547_v38 = vmul.f32 %v291_v19, %v291_v19  ;;  %v552_v39 = vmul.f32 %v296_v24, %v296_v24  ;;  %v845_v40 = vadd.f32 %v551_v17, %v550_v16  ;;  %v300_v52 = vld [vmem:[%s2375_s30 + $0x510] sm:$0xff]  ;;  %v318_v16 = vld [vmem:[%s2375_s30 + $0x5a0] sm:$0xff]  ;;  %v319_v17 = vld [vmem:[%s2375_s30 + $0x5a8] sm:$0xff] }
  0x7c   : > { %v558_v42 = vmul.f32 %v302_v25, %v302_v25  ;;  %v559_v43 = vmul.f32 %v303_v26, %v303_v26  ;;  %v554_v46 = vmul.f32 %v298_v31, %v298_v31  ;;  %v555_v47 = vmul.f32 %v299_v32, %v299_v32  ;;  %v308_v15 = vld [vmem:[%s2375_s30 + $0x550] sm:$0xff] }
  0x7d   : > { %808 = vadd.xlane.f32.xlu1 %v807_v58  ;;  %v827_v48 = vadd.f32 %v826_v22, %v537_v21  ;;  %v545_v49 = vmul.f32 %v289_v33, %v289_v33  ;;  %v836_v50 = vadd.f32 %v835_v30, %v544_v29  ;;  %v541_v51 = vmul.f32 %v285_v34, %v285_v34  ;;  %v314_v21 = vld [vmem:[%s2375_s30 + $0x580] sm:$0xff]  ;;  %v315_v22 = vld [vmem:[%s2375_s30 + $0x588] sm:$0xff]  ;;  %v313_v29 = vld [vmem:[%s2375_s30 + $0x578] sm:$0xff] }
  0x7e   : > { %v822_v55 = vadd.f32 %v821_v28, %v533_v23  ;;  %v831_v56 = vadd.f32 %v830_v36, %v540_v35  ;;  %v548_v57 = vmul.f32 %v292_v41, %v292_v41  ;;  %v840_v58 = vadd.f32 %v547_v38, %v546_v37  ;;  %v327_v28 = vld [vmem:[%s2375_s30 + $0x5e8] sm:$0xff]  ;;  %v309_v30 = vld [vmem:[%s2375_s30 + $0x558] sm:$0xff]  ;;  %v320_v36 = vld [vmem:[%s2375_s30 + $0x5b0] sm:$0xff] }
  0x7f   : > { %803 = vadd.xlane.f32.xlu0 %v802_v11  ;;  %v553_v61 = vmul.f32 %v297_v44, %v297_v44  ;;  %v846_v62 = vadd.f32 %v845_v40, %v552_v39  ;;  %v560_v0 = vmul.f32 %v304_v45, %v304_v45  ;;  %v855_v1 = vadd.f32 %v559_v43, %v558_v42  ;;  %v316_v39 = vld [vmem:[%s2375_s30 + $0x590] sm:$0xff]  ;;  %v322_v42 = vld [vmem:[%s2375_s30 + $0x5c0] sm:$0xff]  ;;  %v323_v43 = vld [vmem:[%s2375_s30 + $0x5c8] sm:$0xff] }
  0x80   : > { %v556_v4 = vmul.f32 %v300_v52, %v300_v52  ;;  %v850_v5 = vadd.f32 %v555_v47, %v554_v46  ;;  %v566_v6 = vmul.f32 %v310_v53, %v310_v53  ;;  %v567_v7 = vmul.f32 %v311_v54, %v311_v54 }
  0x81   : > { %818 = vadd.xlane.f32.xlu1 %v817_v20  ;;  %v837_v8 = vadd.f32 %v836_v50, %v545_v49  ;;  %v562_v10 = vmul.f32 %v306_v59, %v306_v59  ;;  %v563_v11 = vmul.f32 %v307_v60, %v307_v60  ;;  %v832_v12 = vadd.f32 %v831_v56, %v541_v51  ;;  %v334_v49 = vld [vmem:[%s2375_s30 + $0x620] sm:$0xff]  ;;  %v335_v50 = vld [vmem:[%s2375_s30 + $0x628] sm:$0xff] }
  0x82   : > { %v549_v13 = vmul.f32 %v293_v63, %v293_v63  ;;  %v841_v14 = vadd.f32 %v840_v58, %v548_v57  ;;  %v847_v18 = vadd.f32 %v846_v62, %v553_v61  ;;  %v561_v19 = vmul.f32 %v305_v2, %v305_v2  ;;  %v331_v56 = vld [vmem:[%s2375_s30 + $0x608] sm:$0xff]  ;;  %v321_v57 = vld [vmem:[%s2375_s30 + $0x5b8] sm:$0xff] }
  0x83   : > { %813 = vadd.xlane.f32.xlu0 %v812_v27  ;;  %v557_v20 = vmul.f32 %v301_v3, %v301_v3  ;;  %v856_v23 = vadd.f32 %v855_v1, %v560_v0  ;;  %v851_v24 = vadd.f32 %v850_v5, %v556_v4  ;;  %v568_v25 = vmul.f32 %v312_v9, %v312_v9  ;;  %v326_v27 = vld [vmem:[%s2375_s30 + $0x5e0] sm:$0xff]  ;;  %v317_v58 = vld [vmem:[%s2375_s30 + $0x598] sm:$0xff]  ;;  %v324_v1 = vld [vmem:[%s2375_s30 + $0x5d0] sm:$0xff] }
  0x84   : > { %v865_v26 = vadd.f32 %v567_v7, %v566_v6  ;;  %v564_v31 = vmul.f32 %v308_v15, %v308_v15  ;;  %v860_v32 = vadd.f32 %v563_v11, %v562_v10  ;;  %v574_v33 = vmul.f32 %v318_v16, %v318_v16  ;;  %v329_v4 = vld [vmem:[%s2375_s30 + $0x5f8] sm:$0xff]  ;;  %v336_v5 = vld [vmem:[%s2375_s30 + $0x630] sm:$0xff] }
  0x85   : > { %828 = vadd.xlane.f32.xlu1 %v827_v48  ;;  %v575_v34 = vmul.f32 %v319_v17, %v319_v17  ;;  %v842_v35 = vadd.f32 %v841_v14, %v549_v13  ;;  %v570_v37 = vmul.f32 %v314_v21, %v314_v21  ;;  %v571_v38 = vmul.f32 %v315_v22, %v315_v22  ;;  %v328_v48 = vld [vmem:[%s2375_s30 + $0x5f0] sm:$0xff]  ;;  %v342_v13 = vld [vmem:[%s2375_s30 + $0x660] sm:$0xff]  ;;  %v343_v14 = vld [vmem:[%s2375_s30 + $0x668] sm:$0xff] }
  0x86   : > { %v582_v40 = vmul.f32 %v326_v27, %v326_v27  ;;  %v583_v41 = vmul.f32 %v327_v28, %v327_v28  ;;  %v857_v44 = vadd.f32 %v856_v23, %v561_v19  ;;  %v569_v45 = vmul.f32 %v313_v29, %v313_v29  ;;  %v338_v19 = vld [vmem:[%s2375_s30 + $0x640] sm:$0xff]  ;;  %v325_v23 = vld [vmem:[%s2375_s30 + $0x5d8] sm:$0xff] }
  0x87   : > { %823 = vadd.xlane.f32.xlu0 %v822_v55  ;;  %v866_v46 = vadd.f32 %v865_v26, %v568_v25  ;;  %v565_v47 = vmul.f32 %v309_v30, %v309_v30  ;;  %v852_v51 = vadd.f32 %v851_v24, %v557_v20  ;;  %v861_v52 = vadd.f32 %v860_v32, %v564_v31  ;;  %v330_v55 = vld [vmem:[%s2375_s30 + $0x600] sm:$0xff]  ;;  %v339_v20 = vld [vmem:[%s2375_s30 + $0x648] sm:$0xff]  ;;  %v337_v26 = vld [vmem:[%s2375_s30 + $0x638] sm:$0xff] }
  0x88   : > { %v576_v53 = vmul.f32 %v320_v36, %v320_v36  ;;  %v875_v54 = vadd.f32 %v575_v34, %v574_v33  ;;  %v572_v59 = vmul.f32 %v316_v39, %v316_v39  ;;  %v870_v60 = vadd.f32 %v571_v38, %v570_v37  ;;  %v333_v27 = vld [vmem:[%s2375_s30 + $0x618] sm:$0xff]  ;;  %v344_v33 = vld [vmem:[%s2375_s30 + $0x670] sm:$0xff] }
  0x89   : > { %838 = vadd.xlane.f32.xlu1 %v837_v8  ;;  %v578_v61 = vmul.f32 %v322_v42, %v322_v42  ;;  %v579_v62 = vmul.f32 %v323_v43, %v323_v43  ;;  %v584_v63 = vmul.f32 %v328_v48, %v328_v48  ;;  %v885_v0 = vadd.f32 %v583_v41, %v582_v40  ;;  %v340_v39 = vld [vmem:[%s2375_s30 + $0x650] sm:$0xff]  ;;  %v350_v40 = vld [vmem:[%s2375_s30 + $0x6a0] sm:$0xff]  ;;  %v351_v41 = vld [vmem:[%s2375_s30 + $0x6a8] sm:$0xff] }
  0x8a   : > { %v590_v2 = vmul.f32 %v334_v49, %v334_v49  ;;  %v591_v3 = vmul.f32 %v335_v50, %v335_v50  ;;  %v586_v6 = vmul.f32 %v330_v55, %v330_v55  ;;  %v587_v7 = vmul.f32 %v331_v56, %v331_v56 }
  0x8b   : > { %833 = vadd.xlane.f32.xlu0 %v832_v12  ;;  %v867_v8 = vadd.f32 %v866_v46, %v569_v45  ;;  %v577_v9 = vmul.f32 %v321_v57, %v321_v57  ;;  %v876_v10 = vadd.f32 %v875_v54, %v576_v53  ;;  %v573_v11 = vmul.f32 %v317_v58, %v317_v58  ;;  %v332_v12 = vld [vmem:[%s2375_s30 + $0x610] sm:$0xff]  ;;  %v346_v45 = vld [vmem:[%s2375_s30 + $0x680] sm:$0xff]  ;;  %v347_v46 = vld [vmem:[%s2375_s30 + $0x688] sm:$0xff] }
  0x8c   : > { %v862_v15 = vadd.f32 %v861_v52, %v565_v47  ;;  %v871_v16 = vadd.f32 %v870_v60, %v572_v59  ;;  %v580_v17 = vmul.f32 %v324_v1, %v324_v1  ;;  %v585_v21 = vmul.f32 %v329_v4, %v329_v4  ;;  %v359_v52 = vld [vmem:[%s2375_s30 + $0x6e8] sm:$0xff]  ;;  %v345_v53 = vld [vmem:[%s2375_s30 + $0x678] sm:$0xff]  ;;  %v352_v60 = vld [vmem:[%s2375_s30 + $0x6b0] sm:$0xff] }
  0x8d   : > { %848 = vadd.xlane.f32.xlu1 %v847_v18  ;;  %v880_v18 = vadd.f32 %v579_v62, %v578_v61  ;;  %v886_v22 = vadd.f32 %v885_v0, %v584_v63  ;;  %v592_v24 = vmul.f32 %v336_v5, %v336_v5  ;;  %v895_v25 = vadd.f32 %v591_v3, %v590_v2  ;;  %v341_v54 = vld [vmem:[%s2375_s30 + $0x658] sm:$0xff]  ;;  %v348_v63 = vld [vmem:[%s2375_s30 + $0x690] sm:$0xff]  ;;  %v354_v2 = vld [vmem:[%s2375_s30 + $0x6c0] sm:$0xff] }
  0x8e   : > { %v588_v28 = vmul.f32 %v332_v12, %v332_v12  ;;  %v890_v29 = vadd.f32 %v587_v7, %v586_v6  ;;  %v598_v30 = vmul.f32 %v342_v13, %v342_v13  ;;  %v599_v31 = vmul.f32 %v343_v14, %v343_v14  ;;  %v355_v3 = vld [vmem:[%s2375_s30 + $0x6c8] sm:$0xff] }
  0x8f   : > { %843 = vadd.xlane.f32.xlu0 %v842_v35  ;;  %v877_v32 = vadd.f32 %v876_v10, %v577_v9  ;;  %v594_v34 = vmul.f32 %v338_v19, %v338_v19  ;;  %v595_v35 = vmul.f32 %v339_v20, %v339_v20  ;;  %v872_v36 = vadd.f32 %v871_v16, %v573_v11  ;;  %v366_v9 = vld [vmem:[%s2375_s30 + $0x720] sm:$0xff]  ;;  %v367_v10 = vld [vmem:[%s2375_s30 + $0x728] sm:$0xff] }
  0x90   : > { %v581_v37 = vmul.f32 %v325_v23, %v325_v23  ;;  %v881_v38 = vadd.f32 %v880_v18, %v580_v17  ;;  %v887_v42 = vadd.f32 %v886_v22, %v585_v21  ;;  %v593_v43 = vmul.f32 %v337_v26, %v337_v26  ;;  %v363_v16 = vld [vmem:[%s2375_s30 + $0x708] sm:$0xff]  ;;  %v353_v17 = vld [vmem:[%s2375_s30 + $0x6b8] sm:$0xff] }
  0x91   : > { %858 = vadd.xlane.f32.xlu1 %v857_v44  ;;  %v589_v44 = vmul.f32 %v333_v27, %v333_v27  ;;  %v896_v47 = vadd.f32 %v895_v25, %v592_v24  ;;  %v891_v48 = vadd.f32 %v890_v29, %v588_v28  ;;  %v600_v49 = vmul.f32 %v344_v33, %v344_v33  ;;  %v349_v18 = vld [vmem:[%s2375_s30 + $0x698] sm:$0xff]  ;;  %v356_v25 = vld [vmem:[%s2375_s30 + $0x6d0] sm:$0xff] }
  0x92   : > { %v905_v50 = vadd.f32 %v599_v31, %v598_v30  ;;  %v596_v55 = vmul.f32 %v340_v39, %v340_v39  ;;  %v900_v56 = vadd.f32 %v595_v35, %v594_v34  ;;  %v606_v57 = vmul.f32 %v350_v40, %v350_v40  ;;  %v361_v28 = vld [vmem:[%s2375_s30 + $0x6f8] sm:$0xff]  ;;  %v368_v29 = vld [vmem:[%s2375_s30 + $0x730] sm:$0xff] }
  0x93   : > { %853 = vadd.xlane.f32.xlu0 %v852_v51  ;;  %v358_v51 = vld [vmem:[%s2375_s30 + $0x6e0] sm:$0xff]  ;;  %v607_v58 = vmul.f32 %v351_v41, %v351_v41  ;;  %v882_v59 = vadd.f32 %v881_v38, %v581_v37  ;;  %v602_v61 = vmul.f32 %v346_v45, %v346_v45  ;;  %v603_v62 = vmul.f32 %v347_v46, %v347_v46  ;;  %v375_v38 = vld [vmem:[%s2375_s30 + $0x768] sm:$0xff] }
  0x94   : > { %v614_v0 = vmul.f32 %v358_v51, %v358_v51  ;;  %v615_v1 = vmul.f32 %v359_v52, %v359_v52  ;;  %v897_v4 = vadd.f32 %v896_v47, %v593_v43  ;;  %v601_v5 = vmul.f32 %v345_v53, %v345_v53  ;;  %v374_v37 = vld [vmem:[%s2375_s30 + $0x760] sm:$0xff]  ;;  %v357_v47 = vld [vmem:[%s2375_s30 + $0x6d8] sm:$0xff] }
  0x95   : > { %868 = vadd.xlane.f32.xlu1 %v867_v8  ;;  %v906_v6 = vadd.f32 %v905_v50, %v600_v49  ;;  %v597_v7 = vmul.f32 %v341_v54, %v341_v54  ;;  %v360_v8 = vld [vmem:[%s2375_s30 + $0x6f0] sm:$0xff]  ;;  %v892_v11 = vadd.f32 %v891_v48, %v589_v44  ;;  %v901_v12 = vadd.f32 %v900_v56, %v596_v55  ;;  %v370_v43 = vld [vmem:[%s2375_s30 + $0x740] sm:$0xff]  ;;  %v371_v44 = vld [vmem:[%s2375_s30 + $0x748] sm:$0xff] }
  0x96   : > { %v608_v13 = vmul.f32 %v352_v60, %v352_v60  ;;  %v915_v14 = vadd.f32 %v607_v58, %v606_v57  ;;  %v604_v19 = vmul.f32 %v348_v63, %v348_v63  ;;  %v910_v20 = vadd.f32 %v603_v62, %v602_v61  ;;  %v369_v50 = vld [vmem:[%s2375_s30 + $0x738] sm:$0xff]  ;;  %v376_v57 = vld [vmem:[%s2375_s30 + $0x770] sm:$0xff] }
  0x97   : > { %863 = vadd.xlane.f32.xlu0 %v862_v15  ;;  %v362_v15 = vld [vmem:[%s2375_s30 + $0x700] sm:$0xff]  ;;  %v610_v21 = vmul.f32 %v354_v2, %v354_v2  ;;  %v611_v22 = vmul.f32 %v355_v3, %v355_v3  ;;  %v616_v23 = vmul.f32 %v360_v8, %v360_v8  ;;  %v925_v24 = vadd.f32 %v615_v1, %v614_v0  ;;  %v365_v56 = vld [vmem:[%s2375_s30 + $0x718] sm:$0xff]  ;;  %v372_v63 = vld [vmem:[%s2375_s30 + $0x750] sm:$0xff] }
  0x98   : > { %v622_v26 = vmul.f32 %v366_v9, %v366_v9  ;;  %v623_v27 = vmul.f32 %v367_v10, %v367_v10  ;;  %v618_v30 = vmul.f32 %v362_v15, %v362_v15  ;;  %v619_v31 = vmul.f32 %v363_v16, %v363_v16  ;;  %v382_v0 = vld [vmem:[%s2375_s30 + $0x7a0] sm:$0xff]  ;;  %v383_v1 = vld [vmem:[%s2375_s30 + $0x7a8] sm:$0xff]  ;;  %v377_v9 = vld [vmem:[%s2375_s30 + $0x778] sm:$0xff] }
  0x99   : > { %878 = vadd.xlane.f32.xlu1 %v877_v32  ;;  %v907_v32 = vadd.f32 %v906_v6, %v601_v5  ;;  %v609_v33 = vmul.f32 %v353_v17, %v353_v17  ;;  %v916_v34 = vadd.f32 %v915_v14, %v608_v13  ;;  %v605_v35 = vmul.f32 %v349_v18, %v349_v18  ;;  %v378_v5 = vld [vmem:[%s2375_s30 + $0x780] sm:$0xff]  ;;  %v379_v6 = vld [vmem:[%s2375_s30 + $0x788] sm:$0xff]  ;;  %v384_v15 = vld [vmem:[%s2375_s30 + $0x7b0] sm:$0xff] }
  0x9a   : > { %v902_v39 = vadd.f32 %v901_v12, %v597_v7  ;;  %v911_v40 = vadd.f32 %v910_v20, %v604_v19  ;;  %v612_v41 = vmul.f32 %v356_v25, %v356_v25  ;;  %v617_v45 = vmul.f32 %v361_v28, %v361_v28  ;;  %v373_v12 = vld [vmem:[%s2375_s30 + $0x758] sm:$0xff]  ;;  %v380_v25 = vld [vmem:[%s2375_s30 + $0x790] sm:$0xff] }
  0x9b   : > { %873 = vadd.xlane.f32.xlu0 %v872_v36  ;;  %v364_v36 = vld [vmem:[%s2375_s30 + $0x710] sm:$0xff]  ;;  %v926_v46 = vadd.f32 %v925_v24, %v616_v23  ;;  %v624_v48 = vmul.f32 %v368_v29, %v368_v29  ;;  %v935_v49 = vadd.f32 %v623_v27, %v622_v26  ;;  %v930_v52 = vadd.f32 %v619_v31, %v618_v30  ;;  %v386_v26 = vld [vmem:[%s2375_s30 + $0x7c0] sm:$0xff]  ;;  %v387_v27 = vld [vmem:[%s2375_s30 + $0x7c8] sm:$0xff] }
  0x9c   : > { %v620_v51 = vmul.f32 %v364_v36, %v364_v36  ;;  %v630_v53 = vmul.f32 %v374_v37, %v374_v37  ;;  %v631_v54 = vmul.f32 %v375_v38, %v375_v38  ;;  %v917_v55 = vadd.f32 %v916_v34, %v609_v33  ;;  %v385_v33 = vld [vmem:[%s2375_s30 + $0x7b8] sm:$0xff] }
  0x9d   : > { %888 = vadd.xlane.f32.xlu1 %v887_v42  ;;  %v920_v42 = vadd.f32 %v611_v22, %v610_v21  ;;  %v626_v58 = vmul.f32 %v370_v43, %v370_v43  ;;  %v912_v60 = vadd.f32 %v911_v40, %v605_v35  ;;  %v613_v61 = vmul.f32 %v357_v47, %v357_v47  ;;  %v390_v21 = vld [vmem:[%s2375_s30 + $0x7e0] sm:$0xff]  ;;  %v391_v22 = vld [vmem:[%s2375_s30 + $0x7e8] sm:$0xff]  ;;  %v381_v37 = vld [vmem:[%s2375_s30 + $0x798] sm:$0xff] }
  0x9e   : > { %v927_v2 = vadd.f32 %v926_v46, %v617_v45  ;;  %v625_v3 = vmul.f32 %v369_v50, %v369_v50  ;;  %v621_v7 = vmul.f32 %v365_v56, %v365_v56  ;;  %v931_v8 = vadd.f32 %v930_v52, %v620_v51  ;;  %v392_v40 = vld [vmem:[%s2375_s30 + $0x7f0] sm:$0xff]  ;;  %v393_v52 = vld [vmem:[%s2375_s30 + $0x7f8] sm:$0xff] }
  0x9f   : > { %883 = vadd.xlane.f32.xlu0 %v882_v59  ;;  %v627_v59 = vmul.f32 %v371_v44, %v371_v44  ;;  %v921_v62 = vadd.f32 %v920_v42, %v612_v41  ;;  %v632_v10 = vmul.f32 %v376_v57, %v376_v57  ;;  %v628_v13 = vmul.f32 %v372_v63, %v372_v63  ;;  %v388_v43 = vld [vmem:[%s2375_s30 + $0x7d0] sm:$0xff] }
  0xa0   : > { %v638_v16 = vmul.f32 %v382_v0, %v382_v0  ;;  %v639_v17 = vmul.f32 %v383_v1, %v383_v1  ;;  %v634_v19 = vmul.f32 %v378_v5, %v378_v5  ;;  %v635_v20 = vmul.f32 %v379_v6, %v379_v6 }
  0xa1   : > { %898 = vadd.xlane.f32.xlu1 %v897_v4  ;;  %v936_v4 = vadd.f32 %v935_v49, %v624_v48  ;;  %v940_v14 = vadd.f32 %v627_v59, %v626_v58  ;;  %v922_v18 = vadd.f32 %v921_v62, %v613_v61  ;;  %v633_v24 = vmul.f32 %v377_v9, %v377_v9 }
  0xa2   : > { %v932_v28 = vadd.f32 %v931_v8, %v621_v7  ;;  %v629_v30 = vmul.f32 %v373_v12, %v373_v12  ;;  %v640_v31 = vmul.f32 %v384_v15, %v384_v15  ;;  %v955_v34 = vadd.f32 %v639_v17, %v638_v16  ;;  %v1896_v17 = vld [vmem:[%s2375_s30 + $0x40] sm:$0xff] }
  0xa3   : > { %893 = vadd.xlane.f32.xlu0 %v892_v11  ;;  %v945_v11 = vadd.f32 %v631_v54, %v630_v53  ;;  %v937_v23 = vadd.f32 %v936_v4, %v625_v3  ;;  %v646_v35 = vmul.f32 %v390_v21, %v390_v21  ;;  %v647_v36 = vmul.f32 %v391_v22, %v391_v22  ;;  %v1898_v21 = vld [vmem:[%s2375_s30 + $0x50] sm:$0xff] }
  0xa4   : > { %v636_v38 = vmul.f32 %v380_v25, %v380_v25  ;;  %v642_v41 = vmul.f32 %v386_v26, %v386_v26  ;;  %v643_v42 = vmul.f32 %v387_v27, %v387_v27  ;;  %v641_v45 = vmul.f32 %v385_v33, %v385_v33  ;;  %v1900_v25 = vld [vmem:[%s2375_s30] sm:$0xff]  ;;  %v1901_v27 = vld [vmem:[%s2375_s30 + $0x8] sm:$0xff] }
  0xa5   : > { %908 = vadd.xlane.f32.xlu1 %v907_v32  ;;  %v946_v29 = vadd.f32 %v945_v11, %v632_v10  ;;  %v941_v32 = vadd.f32 %v940_v14, %v628_v13  ;;  %v956_v46 = vadd.f32 %v955_v34, %v640_v31  ;;  %v637_v47 = vmul.f32 %v381_v37, %v381_v37  ;;  %v1903_v31 = vld [vmem:[%s2375_s30 + $0x18] sm:$0xff] }
  0xa6   : > { %v648_v48 = vmul.f32 %v392_v40, %v392_v40  ;;  %v965_v49 = vadd.f32 %v647_v36, %v646_v35  ;;  %v644_v53 = vmul.f32 %v388_v43, %v388_v43  ;;  %v960_v54 = vadd.f32 %v643_v42, %v642_v41  ;;  %v1905_v41 = vld [vmem:[%s2375_s30 + $0x68] sm:$0xff]  ;;  %v1906_v43 = vld [vmem:[%s2375_s30 + $0x70] sm:$0xff] }
  0xa7   : > { %903 = vadd.xlane.f32.xlu0 %v902_v39  ;;  %v950_v39 = vadd.f32 %v635_v20, %v634_v19  ;;  %v947_v44 = vadd.f32 %v946_v29, %v633_v24  ;;  %v942_v50 = vadd.f32 %v941_v32, %v629_v30  ;;  %v957_v56 = vadd.f32 %v956_v46, %v641_v45  ;;  %v1897_v19 = vld [vmem:[%s2375_s30 + $0x48] sm:$0xff]  ;;  %v1902_v29 = vld [vmem:[%s2375_s30 + $0x10] sm:$0xff]  ;;  %v1907_v45 = vld [vmem:[%s2375_s30 + $0x78] sm:$0xff] }
  0xa8   : > { %v649_v57 = vmul.f32 %v393_v52, %v393_v52  ;;  %v966_v58 = vadd.f32 %v965_v49, %v648_v48  ;;  %v961_v61 = vadd.f32 %v960_v54, %v644_v53  ;;  %v1909_v49 = vld [vmem:[%s2375_s30 + $0x28] sm:$0xff]  ;;  %v1911_v53 = vld [vmem:[%s2375_s30 + $0x38] sm:$0xff] }
  0xa9   : > { %918 = vadd.xlane.f32.xlu1 %v917_v55  ;;  %v951_v51 = vadd.f32 %v950_v39, %v636_v38  ;;  %v389_v55 = vld [vmem:[%s2375_s30 + $0x7d8] sm:$0xff]  ;;  %v1904_v39 = vld [vmem:[%s2375_s30 + $0x60] sm:$0xff] }
  0xaa   : > { %v967_v62 = vadd.f32 %v966_v58, %v649_v57 }
  0xab   : > { %913 = vadd.xlane.f32.xlu0 %v912_v60  ;;  %v952_v59 = vadd.f32 %v951_v51, %v637_v47  ;;  %v645_v60 = vmul.f32 %v389_v55, %v389_v55  ;;  %v1908_v47 = vld [vmem:[%s2375_s30 + $0x20] sm:$0xff]  ;;  %v1910_v51 = vld [vmem:[%s2375_s30 + $0x30] sm:$0xff] }
  0xad   : > { %928 = vadd.xlane.f32.xlu1 %v927_v2  ;;  %v962_v63 = vadd.f32 %v961_v61, %v645_v60  ;;  %v1912_v61 = vld [vmem:[%s2375_s30 + $0xa0] sm:$0xff] }
  0xaf   : > { %923 = vadd.xlane.f32.xlu0 %v922_v18 }
  0xb1   : > { %938 = vadd.xlane.f32.xlu1 %v937_v23  ;;  %v1899_v23 = vld [vmem:[%s2375_s30 + $0x58] sm:$0xff] }
  0xb3   : > { %933 = vadd.xlane.f32.xlu0 %v932_v28 }
  0xb5   : > { %948 = vadd.xlane.f32.xlu1 %v947_v44 }
  0xb7   : > { %943 = vadd.xlane.f32.xlu0 %v942_v50 }
  0xb9   : > { %958 = vadd.xlane.f32.xlu1 %v957_v56 }
  0xbb   : > { %953 = vadd.xlane.f32.xlu0 %v952_v59 }
  0xbd   : > { %968 = vadd.xlane.f32.xlu1 %v967_v62 }
  0xbf   : > { %963 = vadd.xlane.f32.xlu0 %v962_v63  ;;  %v1913_v63 = vld [vmem:[%s2375_s30 + $0xa8] sm:$0xff] }
  0xce   : > { %v664_v0 = vpop.xlane.xlu1 %663 }
  0xcf   : > { %v972_v1 = vmax.f32 %v664_v0, 1e-24 }
  0xd0   : > { %v654_v2 = vpop.xlane.xlu0 %653 }
  0xd1   : > { %v970_v3 = vmax.f32 %v654_v2, 1e-24  ;;  %1768 = vrsqrt.f32 %v972_v1  ;;  %v1914_v1 = vld [vmem:[%s2375_s30 + $0xb0] sm:$0xff] }
  0xd2   : > { %v669_v4 = vpop.xlane.xlu1 %668 }
  0xd3   : > { %1770 = vrsqrt.f32 %v970_v3  ;;  %v973_v5 = vmax.f32 %v669_v4, 1e-24  ;;  %v1915_v3 = vld [vmem:[%s2375_s30 + $0xb8] sm:$0xff] }
  0xd4   : > { %v659_v6 = vpop.xlane.xlu0 %658 }
  0xd5   : > { %v971_v7 = vmax.f32 %v659_v6, 1e-24  ;;  %1772 = vrsqrt.f32 %v973_v5  ;;  %v1916_v5 = vld [vmem:[%s2375_s30 + $0x80] sm:$0xff] }
  0xd6   : > { %v679_v8 = vpop.xlane.xlu1 %678 }
  0xd7   : > { %1774 = vrsqrt.f32 %v971_v7  ;;  %v975_v9 = vmax.f32 %v679_v8, 1e-24  ;;  %v1917_v7 = vld [vmem:[%s2375_s30 + $0x88] sm:$0xff] }
  0xd8   : > { %v674_v10 = vpop.xlane.xlu0 %673 }
  0xd9   : > { %v974_v11 = vmax.f32 %v674_v10, 1e-24  ;;  %1776 = vrsqrt.f32 %v975_v9  ;;  %v1918_v9 = vld [vmem:[%s2375_s30 + $0x90] sm:$0xff] }
  0xda   : > { %v689_v12 = vpop.xlane.xlu1 %688 }
  0xdb   : > { %1778 = vrsqrt.f32 %v974_v11  ;;  %v1769_v13 = vpop.eup %1768  ;;  %v977_v14 = vmax.f32 %v689_v12, 1e-24  ;;  %v1919_v11 = vld [vmem:[%s2375_s30 + $0x98] sm:$0xff] }
  0xdc   : > { %v684_v15 = vpop.xlane.xlu0 %683  ;;  %v1106_v18 = vmul.f32 %v1896_v17, %v1769_v13  ;;  %v1107_v20 = vmul.f32 %v1897_v19, %v1769_v13  ;;  %v1108_v22 = vmul.f32 %v1898_v21, %v1769_v13  ;;  %v1109_v24 = vmul.f32 %v1899_v23, %v1769_v13  ;;  %v1920_v19 = vld [vmem:[%s2375_s30 + $0xe0] sm:$0xff]  ;;  %v1921_v21 = vld [vmem:[%s2375_s30 + $0xe8] sm:$0xff]  ;;  %v1922_v23 = vld [vmem:[%s2375_s30 + $0xf0] sm:$0xff] }
  0xdd   : > { %v1771_v16 = vpop.eup %1770  ;;  %1780 = vrsqrt.f32 %v977_v14  ;;  %v976_v33 = vmax.f32 %v684_v15, 1e-24 }
  0xde   : > { %v1098_v26 = vmul.f32 %v1900_v25, %v1771_v16  ;;  %v1099_v28 = vmul.f32 %v1901_v27, %v1771_v16  ;;  %v1100_v30 = vmul.f32 %v1902_v29, %v1771_v16  ;;  %v1101_v32 = vmul.f32 %v1903_v31, %v1771_v16  ;;  %1362 = vst [vmem:[%s2647_s17 + $0x40] sm:$0xff] %v1106_v18  ;;  %v699_v34 = vpop.xlane.xlu1 %698  ;;  %v1923_v25 = vld [vmem:[%s2375_s30 + $0xf8] sm:$0xff] }
  0xdf   : > { %1363 = vst [vmem:[%s2647_s17 + $0x48] sm:$0xff] %v1107_v20  ;;  %1364 = vst [vmem:[%s2647_s17 + $0x50] sm:$0xff] %v1108_v22  ;;  %v1773_v35 = vpop.eup %1772  ;;  %v979_v36 = vmax.f32 %v699_v34, 1e-24  ;;  %1782 = vrsqrt.f32 %v976_v33  ;;  %v1924_v33 = vld [vmem:[%s2375_s30 + $0xc0] sm:$0xff] }
  0xe0   : > { %1365 = vst [vmem:[%s2647_s17 + $0x58] sm:$0xff] %v1109_v24  ;;  %1354 = vst [vmem:[%s2647_s17] sm:$0xff] %v1098_v26  ;;  %v694_v37 = vpop.xlane.xlu0 %693  ;;  %v1110_v40 = vmul.f32 %v1904_v39, %v1773_v35  ;;  %v1111_v42 = vmul.f32 %v1905_v41, %v1773_v35  ;;  %v1112_v44 = vmul.f32 %v1906_v43, %v1773_v35  ;;  %v1927_v39 = vld [vmem:[%s2375_s30 + $0xd8] sm:$0xff]  ;;  %v1928_v41 = vld [vmem:[%s2375_s30 + $0x120] sm:$0xff] }
  0xe1   : > { %1355 = vst [vmem:[%s2647_s17 + $0x8] sm:$0xff] %v1099_v28  ;;  %1356 = vst [vmem:[%s2647_s17 + $0x10] sm:$0xff] %v1100_v30  ;;  %v1775_v38 = vpop.eup %1774  ;;  %v1113_v46 = vmul.f32 %v1907_v45, %v1773_v35  ;;  %v978_v55 = vmax.f32 %v694_v37, 1e-24  ;;  %1784 = vrsqrt.f32 %v979_v36  ;;  %v1925_v35 = vld [vmem:[%s2375_s30 + $0xc8] sm:$0xff]  ;;  %v1926_v37 = vld [vmem:[%s2375_s30 + $0xd0] sm:$0xff] }
  0xe2   : > { %1357 = vst [vmem:[%s2647_s17 + $0x18] sm:$0xff] %v1101_v32  ;;  %v1102_v48 = vmul.f32 %v1908_v47, %v1775_v38  ;;  %v1103_v50 = vmul.f32 %v1909_v49, %v1775_v38  ;;  %v1104_v52 = vmul.f32 %v1910_v51, %v1775_v38  ;;  %v1105_v54 = vmul.f32 %v1911_v53, %v1775_v38  ;;  %v709_v56 = vpop.xlane.xlu1 %708  ;;  %v1929_v43 = vld [vmem:[%s2375_s30 + $0x128] sm:$0xff]  ;;  %v1930_v45 = vld [vmem:[%s2375_s30 + $0x130] sm:$0xff]  ;;  %v1931_v47 = vld [vmem:[%s2375_s30 + $0x138] sm:$0xff] }
  0xe3   : > { %1366 = vst [vmem:[%s2647_s17 + $0x60] sm:$0xff] %v1110_v40  ;;  %1367 = vst [vmem:[%s2647_s17 + $0x68] sm:$0xff] %v1111_v42  ;;  %v1777_v57 = vpop.eup %1776  ;;  %v981_v58 = vmax.f32 %v709_v56, 1e-24  ;;  %1786 = vrsqrt.f32 %v978_v55  ;;  %v1932_v55 = vld [vmem:[%s2375_s30 + $0x100] sm:$0xff] }
  0xe4   : > { %1368 = vst [vmem:[%s2647_s17 + $0x70] sm:$0xff] %v1112_v44  ;;  %1369 = vst [vmem:[%s2647_s17 + $0x78] sm:$0xff] %v1113_v46  ;;  %v704_v59 = vpop.xlane.xlu0 %703  ;;  %v1118_v62 = vmul.f32 %v1912_v61, %v1777_v57  ;;  %v1119_v0 = vmul.f32 %v1913_v63, %v1777_v57  ;;  %v1120_v2 = vmul.f32 %v1914_v1, %v1777_v57  ;;  %v1935_v61 = vld [vmem:[%s2375_s30 + $0x118] sm:$0xff] }
  0xe5   : > { %1358 = vst [vmem:[%s2647_s17 + $0x20] sm:$0xff] %v1102_v48  ;;  %1359 = vst [vmem:[%s2647_s17 + $0x28] sm:$0xff] %v1103_v50  ;;  %v1779_v60 = vpop.eup %1778  ;;  %v1121_v4 = vmul.f32 %v1915_v3, %v1777_v57  ;;  %v980_v13 = vmax.f32 %v704_v59, 1e-24  ;;  %1788 = vrsqrt.f32 %v981_v58  ;;  %v1933_v57 = vld [vmem:[%s2375_s30 + $0x108] sm:$0xff]  ;;  %v1934_v59 = vld [vmem:[%s2375_s30 + $0x110] sm:$0xff] }
  0xe6   : > { %1360 = vst [vmem:[%s2647_s17 + $0x30] sm:$0xff] %v1104_v52  ;;  %1361 = vst [vmem:[%s2647_s17 + $0x38] sm:$0xff] %v1105_v54  ;;  %v1114_v6 = vmul.f32 %v1916_v5, %v1779_v60  ;;  %v1115_v8 = vmul.f32 %v1917_v7, %v1779_v60  ;;  %v1116_v10 = vmul.f32 %v1918_v9, %v1779_v60  ;;  %v719_v14 = vpop.xlane.xlu1 %718  ;;  %v1940_v9 = vld [vmem:[%s2375_s30 + $0x140] sm:$0xff] }
  0xe7   : > { %v1117_v12 = vmul.f32 %v1919_v11, %v1779_v60  ;;  %1374 = vst [vmem:[%s2647_s17 + $0xa0] sm:$0xff] %v1118_v62  ;;  %1375 = vst [vmem:[%s2647_s17 + $0xa8] sm:$0xff] %v1119_v0  ;;  %v983_v15 = vmax.f32 %v719_v14, 1e-24  ;;  %v1781_v17 = vpop.eup %1780  ;;  %1790 = vrsqrt.f32 %v980_v13  ;;  %v1936_v0 = vld [vmem:[%s2375_s30 + $0x160] sm:$0xff]  ;;  %v1941_v11 = vld [vmem:[%s2375_s30 + $0x148] sm:$0xff] }
  0xe8   : > { %1376 = vst [vmem:[%s2647_s17 + $0xb0] sm:$0xff] %v1120_v2  ;;  %1377 = vst [vmem:[%s2647_s17 + $0xb8] sm:$0xff] %v1121_v4  ;;  %v714_v16 = vpop.xlane.xlu0 %713  ;;  %v1126_v20 = vmul.f32 %v1920_v19, %v1781_v17  ;;  %v1127_v22 = vmul.f32 %v1921_v21, %v1781_v17  ;;  %v1128_v24 = vmul.f32 %v1922_v23, %v1781_v17  ;;  %v1937_v2 = vld [vmem:[%s2375_s30 + $0x168] sm:$0xff]  ;;  %v1938_v4 = vld [vmem:[%s2375_s30 + $0x170] sm:$0xff] }
  0xe9   : > { %1370 = vst [vmem:[%s2647_s17 + $0x80] sm:$0xff] %v1114_v6  ;;  %1371 = vst [vmem:[%s2647_s17 + $0x88] sm:$0xff] %v1115_v8  ;;  %v982_v18 = vmax.f32 %v714_v16, 1e-24  ;;  %v1129_v26 = vmul.f32 %v1923_v25, %v1781_v17  ;;  %1792 = vrsqrt.f32 %v983_v15  ;;  %v1783_v30 = vpop.eup %1782  ;;  %v1939_v6 = vld [vmem:[%s2375_s30 + $0x178] sm:$0xff]  ;;  %v1942_v13 = vld [vmem:[%s2375_s30 + $0x150] sm:$0xff] }
  0xea   : > { %1372 = vst [vmem:[%s2647_s17 + $0x90] sm:$0xff] %v1116_v10  ;;  %1373 = vst [vmem:[%s2647_s17 + $0x98] sm:$0xff] %v1117_v12  ;;  %v729_v27 = vpop.xlane.xlu1 %728  ;;  %v1122_v34 = vmul.f32 %v1924_v33, %v1783_v30  ;;  %v1123_v36 = vmul.f32 %v1925_v35, %v1783_v30  ;;  %v1124_v38 = vmul.f32 %v1926_v37, %v1783_v30  ;;  %v1943_v15 = vld [vmem:[%s2375_s30 + $0x158] sm:$0xff] }
  0xeb   : > { %1382 = vst [vmem:[%s2647_s17 + $0xe0] sm:$0xff] %v1126_v20  ;;  %1383 = vst [vmem:[%s2647_s17 + $0xe8] sm:$0xff] %v1127_v22  ;;  %1794 = vrsqrt.f32 %v982_v18  ;;  %v985_v28 = vmax.f32 %v729_v27, 1e-24  ;;  %v1785_v32 = vpop.eup %1784  ;;  %v1125_v40 = vmul.f32 %v1927_v39, %v1783_v30  ;;  %v1944_v22 = vld [vmem:[%s2375_s30 + $0x1a0] sm:$0xff] }
  0xec   : > { %1384 = vst [vmem:[%s2647_s17 + $0xf0] sm:$0xff] %v1128_v24  ;;  %1385 = vst [vmem:[%s2647_s17 + $0xf8] sm:$0xff] %v1129_v26  ;;  %v724_v29 = vpop.xlane.xlu0 %723  ;;  %v1134_v42 = vmul.f32 %v1928_v41, %v1785_v32  ;;  %v1135_v44 = vmul.f32 %v1929_v43, %v1785_v32  ;;  %v1136_v46 = vmul.f32 %v1930_v45, %v1785_v32  ;;  %v1945_v24 = vld [vmem:[%s2375_s30 + $0x1a8] sm:$0xff]  ;;  %v1946_v26 = vld [vmem:[%s2375_s30 + $0x1b0] sm:$0xff] }
  0xed   : > { %v984_v31 = vmax.f32 %v724_v29, 1e-24  ;;  %v1137_v48 = vmul.f32 %v1931_v47, %v1785_v32  ;;  %1378 = vst [vmem:[%s2647_s17 + $0xc0] sm:$0xff] %v1122_v34  ;;  %1379 = vst [vmem:[%s2647_s17 + $0xc8] sm:$0xff] %v1123_v36  ;;  %1796 = vrsqrt.f32 %v985_v28  ;;  %v1787_v51 = vpop.eup %1786  ;;  %v1947_v28 = vld [vmem:[%s2375_s30 + $0x1b8] sm:$0xff]  ;;  %v1948_v30 = vld [vmem:[%s2375_s30 + $0x180] sm:$0xff] }
  0xee   : > { %v739_v49 = vpop.xlane.xlu1 %738  ;;  %1380 = vst [vmem:[%s2647_s17 + $0xd0] sm:$0xff] %v1124_v38  ;;  %1381 = vst [vmem:[%s2647_s17 + $0xd8] sm:$0xff] %v1125_v40  ;;  %v1130_v56 = vmul.f32 %v1932_v55, %v1787_v51  ;;  %v1131_v58 = vmul.f32 %v1933_v57, %v1787_v51  ;;  %v1132_v60 = vmul.f32 %v1934_v59, %v1787_v51  ;;  %v1949_v32 = vld [vmem:[%s2375_s30 + $0x188] sm:$0xff]  ;;  %v1950_v34 = vld [vmem:[%s2375_s30 + $0x190] sm:$0xff] }
  0xef   : > { %1390 = vst [vmem:[%s2647_s17 + $0x120] sm:$0xff] %v1134_v42  ;;  %1391 = vst [vmem:[%s2647_s17 + $0x128] sm:$0xff] %v1135_v44  ;;  %1798 = vrsqrt.f32 %v984_v31  ;;  %v987_v52 = vmax.f32 %v739_v49, 1e-24  ;;  %v1789_v54 = vpop.eup %1788  ;;  %v1133_v62 = vmul.f32 %v1935_v61, %v1787_v51  ;;  %v1951_v36 = vld [vmem:[%s2375_s30 + $0x198] sm:$0xff]  ;;  %v1952_v44 = vld [vmem:[%s2375_s30 + $0x1e0] sm:$0xff] }
  0xf0   : > { %v2709_v50 = vpop.xlane.xlu0 %733  ;;  %1392 = vst [vmem:[%s2647_s17 + $0x130] sm:$0xff] %v1136_v46  ;;  %1393 = vst [vmem:[%s2647_s17 + $0x138] sm:$0xff] %v1137_v48  ;;  %v1142_v1 = vmul.f32 %v1936_v0, %v1789_v54  ;;  %v1143_v3 = vmul.f32 %v1937_v2, %v1789_v54  ;;  %v1144_v5 = vmul.f32 %v1938_v4, %v1789_v54  ;;  %v1953_v46 = vld [vmem:[%s2375_s30 + $0x1e8] sm:$0xff]  ;;  %v1954_v48 = vld [vmem:[%s2375_s30 + $0x1f0] sm:$0xff] }
  0xf1   : > { %v986_v53 = vmax.f32 %v2709_v50, 1e-24  ;;  %v1791_v63 = vpop.eup %1790  ;;  %v1145_v7 = vmul.f32 %v1939_v6, %v1789_v54  ;;  %1386 = vst [vmem:[%s2647_s17 + $0x100] sm:$0xff] %v1130_v56  ;;  %1387 = vst [vmem:[%s2647_s17 + $0x108] sm:$0xff] %v1131_v58  ;;  %1800 = vrsqrt.f32 %v987_v52  ;;  %v1955_v50 = vld [vmem:[%s2375_s30 + $0x1f8] sm:$0xff]  ;;  %v1957_v55 = vld [vmem:[%s2375_s30 + $0x1c8] sm:$0xff] }
  0xf2   : > { %v749_v8 = vpop.xlane.xlu1 %748  ;;  %1388 = vst [vmem:[%s2647_s17 + $0x110] sm:$0xff] %v1132_v60  ;;  %1389 = vst [vmem:[%s2647_s17 + $0x118] sm:$0xff] %v1133_v62  ;;  %v1138_v10 = vmul.f32 %v1940_v9, %v1791_v63  ;;  %v1139_v12 = vmul.f32 %v1941_v11, %v1791_v63  ;;  %v1140_v14 = vmul.f32 %v1942_v13, %v1791_v63  ;;  %v1958_v57 = vld [vmem:[%s2375_s30 + $0x1d0] sm:$0xff]  ;;  %v1959_v59 = vld [vmem:[%s2375_s30 + $0x1d8] sm:$0xff] }
  0xf3   : > { %v1141_v16 = vmul.f32 %v1943_v15, %v1791_v63  ;;  %v1793_v18 = vpop.eup %1792  ;;  %1398 = vst [vmem:[%s2647_s17 + $0x160] sm:$0xff] %v1142_v1  ;;  %1399 = vst [vmem:[%s2647_s17 + $0x168] sm:$0xff] %v1143_v3  ;;  %v989_v19 = vmax.f32 %v749_v8, 1e-24  ;;  %1802 = vrsqrt.f32 %v986_v53  ;;  %v1956_v53 = vld [vmem:[%s2375_s30 + $0x1c0] sm:$0xff]  ;;  %v1961_v4 = vld [vmem:[%s2375_s30 + $0x228] sm:$0xff] }
  0xf4   : > { %v744_v17 = vpop.xlane.xlu0 %743  ;;  %1400 = vst [vmem:[%s2647_s17 + $0x170] sm:$0xff] %v1144_v5  ;;  %1401 = vst [vmem:[%s2647_s17 + $0x178] sm:$0xff] %v1145_v7  ;;  %v1150_v23 = vmul.f32 %v1944_v22, %v1793_v18  ;;  %v1151_v25 = vmul.f32 %v1945_v24, %v1793_v18  ;;  %v1152_v27 = vmul.f32 %v1946_v26, %v1793_v18  ;;  %v1960_v2 = vld [vmem:[%s2375_s30 + $0x220] sm:$0xff]  ;;  %v1962_v6 = vld [vmem:[%s2375_s30 + $0x230] sm:$0xff] }
  0xf5   : > { %v988_v20 = vmax.f32 %v744_v17, 1e-24  ;;  %v1795_v21 = vpop.eup %1794  ;;  %1394 = vst [vmem:[%s2647_s17 + $0x140] sm:$0xff] %v1138_v10  ;;  %1395 = vst [vmem:[%s2647_s17 + $0x148] sm:$0xff] %v1139_v12  ;;  %v1153_v29 = vmul.f32 %v1947_v28, %v1793_v18  ;;  %1804 = vrsqrt.f32 %v989_v19  ;;  %v1963_v8 = vld [vmem:[%s2375_s30 + $0x238] sm:$0xff]  ;;  %v1964_v15 = vld [vmem:[%s2375_s30 + $0x200] sm:$0xff] }
  0xf6   : > { %1396 = vst [vmem:[%s2647_s17 + $0x150] sm:$0xff] %v1140_v14  ;;  %1397 = vst [vmem:[%s2647_s17 + $0x158] sm:$0xff] %v1141_v16  ;;  %v1146_v31 = vmul.f32 %v1948_v30, %v1795_v21  ;;  %v1147_v33 = vmul.f32 %v1949_v32, %v1795_v21  ;;  %v1148_v35 = vmul.f32 %v1950_v34, %v1795_v21  ;;  %v759_v38 = vpop.xlane.xlu1 %758  ;;  %v1965_v17 = vld [vmem:[%s2375_s30 + $0x208] sm:$0xff]  ;;  %v1966_v19 = vld [vmem:[%s2375_s30 + $0x210] sm:$0xff] }
  0xf7   : > { %v1149_v37 = vmul.f32 %v1951_v36, %v1795_v21  ;;  %1406 = vst [vmem:[%s2647_s17 + $0x1a0] sm:$0xff] %v1150_v23  ;;  %1407 = vst [vmem:[%s2647_s17 + $0x1a8] sm:$0xff] %v1151_v25  ;;  %v991_v40 = vmax.f32 %v759_v38, 1e-24  ;;  %v1797_v41 = vpop.eup %1796  ;;  %1806 = vrsqrt.f32 %v988_v20  ;;  %v1967_v21 = vld [vmem:[%s2375_s30 + $0x218] sm:$0xff]  ;;  %v1968_v25 = vld [vmem:[%s2375_s30 + $0x260] sm:$0xff] }
  0xf8   : > { %1408 = vst [vmem:[%s2647_s17 + $0x1b0] sm:$0xff] %v1152_v27  ;;  %1409 = vst [vmem:[%s2647_s17 + $0x1b8] sm:$0xff] %v1153_v29  ;;  %v754_v39 = vpop.xlane.xlu0 %753  ;;  %v1158_v45 = vmul.f32 %v1952_v44, %v1797_v41  ;;  %v1159_v47 = vmul.f32 %v1953_v46, %v1797_v41  ;;  %v1160_v49 = vmul.f32 %v1954_v48, %v1797_v41  ;;  %v1969_v27 = vld [vmem:[%s2375_s30 + $0x268] sm:$0xff]  ;;  %v1970_v29 = vld [vmem:[%s2375_s30 + $0x270] sm:$0xff] }
  0xf9   : > { %1402 = vst [vmem:[%s2647_s17 + $0x180] sm:$0xff] %v1146_v31  ;;  %1403 = vst [vmem:[%s2647_s17 + $0x188] sm:$0xff] %v1147_v33  ;;  %v990_v42 = vmax.f32 %v754_v39, 1e-24  ;;  %v1799_v43 = vpop.eup %1798  ;;  %v1161_v51 = vmul.f32 %v1955_v50, %v1797_v41  ;;  %1808 = vrsqrt.f32 %v991_v40  ;;  %v1971_v31 = vld [vmem:[%s2375_s30 + $0x278] sm:$0xff]  ;;  %v1972_v34 = vld [vmem:[%s2375_s30 + $0x240] sm:$0xff] }
  0xfa   : > { %1404 = vst [vmem:[%s2647_s17 + $0x190] sm:$0xff] %v1148_v35  ;;  %1405 = vst [vmem:[%s2647_s17 + $0x198] sm:$0xff] %v1149_v37  ;;  %v769_v52 = vpop.xlane.xlu1 %768  ;;  %v1154_v54 = vmul.f32 %v1956_v53, %v1799_v43  ;;  %v1155_v56 = vmul.f32 %v1957_v55, %v1799_v43  ;;  %v1156_v58 = vmul.f32 %v1958_v57, %v1799_v43  ;;  %v1973_v36 = vld [vmem:[%s2375_s30 + $0x248] sm:$0xff]  ;;  %v1974_v38 = vld [vmem:[%s2375_s30 + $0x250] sm:$0xff] }
  0xfb   : > { %v1157_v60 = vmul.f32 %v1959_v59, %v1799_v43  ;;  %1414 = vst [vmem:[%s2647_s17 + $0x1e0] sm:$0xff] %v1158_v45  ;;  %1415 = vst [vmem:[%s2647_s17 + $0x1e8] sm:$0xff] %v1159_v47  ;;  %v993_v62 = vmax.f32 %v769_v52, 1e-24  ;;  %1810 = vrsqrt.f32 %v990_v42  ;;  %v1801_v0 = vpop.eup %1800  ;;  %v1975_v40 = vld [vmem:[%s2375_s30 + $0x258] sm:$0xff]  ;;  %v1976_v47 = vld [vmem:[%s2375_s30 + $0x2a0] sm:$0xff] }
  0xfc   : > { %v764_v61 = vpop.xlane.xlu0 %763  ;;  %1416 = vst [vmem:[%s2647_s17 + $0x1f0] sm:$0xff] %v1160_v49  ;;  %1417 = vst [vmem:[%s2647_s17 + $0x1f8] sm:$0xff] %v1161_v51  ;;  %v1166_v3 = vmul.f32 %v1960_v2, %v1801_v0  ;;  %v1167_v5 = vmul.f32 %v1961_v4, %v1801_v0  ;;  %v1168_v7 = vmul.f32 %v1962_v6, %v1801_v0  ;;  %v1977_v49 = vld [vmem:[%s2375_s30 + $0x2a8] sm:$0xff]  ;;  %v1978_v51 = vld [vmem:[%s2375_s30 + $0x2b0] sm:$0xff] }
  0xfd   : > { %v992_v63 = vmax.f32 %v764_v61, 1e-24  ;;  %1410 = vst [vmem:[%s2647_s17 + $0x1c0] sm:$0xff] %v1154_v54  ;;  %1411 = vst [vmem:[%s2647_s17 + $0x1c8] sm:$0xff] %v1155_v56  ;;  %1812 = vrsqrt.f32 %v993_v62  ;;  %v1169_v9 = vmul.f32 %v1963_v8, %v1801_v0  ;;  %v1803_v11 = vpop.eup %1802  ;;  %v1979_v53 = vld [vmem:[%s2375_s30 + $0x2b8] sm:$0xff]  ;;  %v1980_v57 = vld [vmem:[%s2375_s30 + $0x280] sm:$0xff] }
  0xfe   : > { %1412 = vst [vmem:[%s2647_s17 + $0x1d0] sm:$0xff] %v1156_v58  ;;  %1413 = vst [vmem:[%s2647_s17 + $0x1d8] sm:$0xff] %v1157_v60  ;;  %v779_v1 = vpop.xlane.xlu1 %778  ;;  %v1162_v16 = vmul.f32 %v1964_v15, %v1803_v11  ;;  %v1163_v18 = vmul.f32 %v1965_v17, %v1803_v11  ;;  %v1164_v20 = vmul.f32 %v1966_v19, %v1803_v11  ;;  %v1981_v59 = vld [vmem:[%s2375_s30 + $0x288] sm:$0xff]  ;;  %v1982_v61 = vld [vmem:[%s2375_s30 + $0x290] sm:$0xff] }
  0xff   : > { %1814 = vrsqrt.f32 %v992_v63  ;;  %1422 = vst [vmem:[%s2647_s17 + $0x220] sm:$0xff] %v1166_v3  ;;  %1423 = vst [vmem:[%s2647_s17 + $0x228] sm:$0xff] %v1167_v5  ;;  %v995_v12 = vmax.f32 %v779_v1, 1e-24  ;;  %v1805_v14 = vpop.eup %1804  ;;  %v1165_v22 = vmul.f32 %v1967_v21, %v1803_v11  ;;  %v1983_v63 = vld [vmem:[%s2375_s30 + $0x298] sm:$0xff]  ;;  %v1984_v1 = vld [vmem:[%s2375_s30 + $0x2e0] sm:$0xff] }
 0x100   : > { %v774_v10 = vpop.xlane.xlu0 %773  ;;  %1424 = vst [vmem:[%s2647_s17 + $0x230] sm:$0xff] %v1168_v7  ;;  %1425 = vst [vmem:[%s2647_s17 + $0x238] sm:$0xff] %v1169_v9  ;;  %v1174_v26 = vmul.f32 %v1968_v25, %v1805_v14  ;;  %v1175_v28 = vmul.f32 %v1969_v27, %v1805_v14  ;;  %v1176_v30 = vmul.f32 %v1970_v29, %v1805_v14  ;;  %v1985_v3 = vld [vmem:[%s2375_s30 + $0x2e8] sm:$0xff]  ;;  %v1986_v5 = vld [vmem:[%s2375_s30 + $0x2f0] sm:$0xff] }
 0x101   : > { %v994_v13 = vmax.f32 %v774_v10, 1e-24  ;;  %v1807_v24 = vpop.eup %1806  ;;  %v1177_v32 = vmul.f32 %v1971_v31, %v1805_v14  ;;  %1418 = vst [vmem:[%s2647_s17 + $0x200] sm:$0xff] %v1162_v16  ;;  %1419 = vst [vmem:[%s2647_s17 + $0x208] sm:$0xff] %v1163_v18  ;;  %1816 = vrsqrt.f32 %v995_v12  ;;  %v1987_v7 = vld [vmem:[%s2375_s30 + $0x2f8] sm:$0xff]  ;;  %v1989_v15 = vld [vmem:[%s2375_s30 + $0x2c8] sm:$0xff] }
 0x102   : > { %v2786_v23 = vpop.xlane.xlu1 %788  ;;  %1420 = vst [vmem:[%s2647_s17 + $0x210] sm:$0xff] %v1164_v20  ;;  %1421 = vst [vmem:[%s2647_s17 + $0x218] sm:$0xff] %v1165_v22  ;;  %v1170_v35 = vmul.f32 %v1972_v34, %v1807_v24  ;;  %v1171_v37 = vmul.f32 %v1973_v36, %v1807_v24  ;;  %v1172_v39 = vmul.f32 %v1974_v38, %v1807_v24  ;;  %v1990_v17 = vld [vmem:[%s2375_s30 + $0x2d0] sm:$0xff]  ;;  %v1991_v19 = vld [vmem:[%s2375_s30 + $0x2d8] sm:$0xff] }
 0x103   : > { %v1173_v41 = vmul.f32 %v1975_v40, %v1807_v24  ;;  %1430 = vst [vmem:[%s2647_s17 + $0x260] sm:$0xff] %v1174_v26  ;;  %1431 = vst [vmem:[%s2647_s17 + $0x268] sm:$0xff] %v1175_v28  ;;  %v1809_v42 = vpop.eup %1808  ;;  %1818 = vrsqrt.f32 %v994_v13  ;;  %v997_v43 = vmax.f32 %v2786_v23, 1e-24  ;;  %v1988_v13 = vld [vmem:[%s2375_s30 + $0x2c0] sm:$0xff]  ;;  %v1993_v31 = vld [vmem:[%s2375_s30 + $0x328] sm:$0xff] }
 0x104   : > { %v2792_v33 = vpop.xlane.xlu0 %783  ;;  %1432 = vst [vmem:[%s2647_s17 + $0x270] sm:$0xff] %v1176_v30  ;;  %1433 = vst [vmem:[%s2647_s17 + $0x278] sm:$0xff] %v1177_v32  ;;  %v1182_v48 = vmul.f32 %v1976_v47, %v1809_v42  ;;  %v1183_v50 = vmul.f32 %v1977_v49, %v1809_v42  ;;  %v1184_v52 = vmul.f32 %v1978_v51, %v1809_v42  ;;  %v1992_v29 = vld [vmem:[%s2375_s30 + $0x320] sm:$0xff] }
 0x105   : > { %1426 = vst [vmem:[%s2647_s17 + $0x240] sm:$0xff] %v1170_v35  ;;  %1427 = vst [vmem:[%s2647_s17 + $0x248] sm:$0xff] %v1171_v37  ;;  %v996_v44 = vmax.f32 %v2792_v33, 1e-24  ;;  %v1811_v46 = vpop.eup %1810  ;;  %v1185_v54 = vmul.f32 %v1979_v53, %v1809_v42  ;;  %1820 = vrsqrt.f32 %v997_v43  ;;  %v1994_v33 = vld [vmem:[%s2375_s30 + $0x330] sm:$0xff]  ;;  %v1995_v35 = vld [vmem:[%s2375_s30 + $0x338] sm:$0xff] }
 0x106   : > { %1428 = vst [vmem:[%s2647_s17 + $0x250] sm:$0xff] %v1172_v39  ;;  %1429 = vst [vmem:[%s2647_s17 + $0x258] sm:$0xff] %v1173_v41  ;;  %v799_v45 = vpop.xlane.xlu1 %798  ;;  %v1178_v58 = vmul.f32 %v1980_v57, %v1811_v46  ;;  %v1179_v60 = vmul.f32 %v1981_v59, %v1811_v46  ;;  %v1180_v62 = vmul.f32 %v1982_v61, %v1811_v46  ;;  %v1996_v37 = vld [vmem:[%s2375_s30 + $0x300] sm:$0xff]  ;;  %v1997_v39 = vld [vmem:[%s2375_s30 + $0x308] sm:$0xff] }
 0x107   : > { %v1813_v56 = vpop.eup %1812  ;;  %v1181_v0 = vmul.f32 %v1983_v63, %v1811_v46  ;;  %1438 = vst [vmem:[%s2647_s17 + $0x2a0] sm:$0xff] %v1182_v48  ;;  %1439 = vst [vmem:[%s2647_s17 + $0x2a8] sm:$0xff] %v1183_v50  ;;  %v999_v10 = vmax.f32 %v799_v45, 1e-24  ;;  %1822 = vrsqrt.f32 %v996_v44  ;;  %v1998_v41 = vld [vmem:[%s2375_s30 + $0x310] sm:$0xff]  ;;  %v1999_v43 = vld [vmem:[%s2375_s30 + $0x318] sm:$0xff] }
 0x108   : > { %v794_v55 = vpop.xlane.xlu0 %793  ;;  %1440 = vst [vmem:[%s2647_s17 + $0x2b0] sm:$0xff] %v1184_v52  ;;  %1441 = vst [vmem:[%s2647_s17 + $0x2b8] sm:$0xff] %v1185_v54  ;;  %v1190_v2 = vmul.f32 %v1984_v1, %v1813_v56  ;;  %v1191_v4 = vmul.f32 %v1985_v3, %v1813_v56  ;;  %v1192_v6 = vmul.f32 %v1986_v5, %v1813_v56  ;;  %v2000_v50 = vld [vmem:[%s2375_s30 + $0x360] sm:$0xff]  ;;  %v2001_v52 = vld [vmem:[%s2375_s30 + $0x368] sm:$0xff] }
 0x109   : > { %v1193_v8 = vmul.f32 %v1987_v7, %v1813_v56  ;;  %v1815_v9 = vpop.eup %1814  ;;  %1434 = vst [vmem:[%s2647_s17 + $0x280] sm:$0xff] %v1178_v58  ;;  %1435 = vst [vmem:[%s2647_s17 + $0x288] sm:$0xff] %v1179_v60  ;;  %v998_v11 = vmax.f32 %v794_v55, 1e-24  ;;  %1824 = vrsqrt.f32 %v999_v10  ;;  %v2002_v54 = vld [vmem:[%s2375_s30 + $0x370] sm:$0xff]  ;;  %v2003_v56 = vld [vmem:[%s2375_s30 + $0x378] sm:$0xff] }
 0x10a   : > { %1436 = vst [vmem:[%s2647_s17 + $0x290] sm:$0xff] %v1180_v62  ;;  %1437 = vst [vmem:[%s2647_s17 + $0x298] sm:$0xff] %v1181_v0  ;;  %v809_v12 = vpop.xlane.xlu1 %808  ;;  %v1186_v14 = vmul.f32 %v1988_v13, %v1815_v9  ;;  %v1187_v16 = vmul.f32 %v1989_v15, %v1815_v9  ;;  %v1188_v18 = vmul.f32 %v1990_v17, %v1815_v9  ;;  %v2004_v62 = vld [vmem:[%s2375_s30 + $0x340] sm:$0xff]  ;;  %v2005_v0 = vld [vmem:[%s2375_s30 + $0x348] sm:$0xff] }
 0x10b   : > { %1446 = vst [vmem:[%s2647_s17 + $0x2e0] sm:$0xff] %v1190_v2  ;;  %1447 = vst [vmem:[%s2647_s17 + $0x2e8] sm:$0xff] %v1191_v4  ;;  %v1189_v20 = vmul.f32 %v1991_v19, %v1815_v9  ;;  %v1001_v22 = vmax.f32 %v809_v12, 1e-24  ;;  %1826 = vrsqrt.f32 %v998_v11  ;;  %v1817_v25 = vpop.eup %1816  ;;  %v2006_v2 = vld [vmem:[%s2375_s30 + $0x350] sm:$0xff]  ;;  %v2007_v4 = vld [vmem:[%s2375_s30 + $0x358] sm:$0xff] }
 0x10c   : > { %1448 = vst [vmem:[%s2647_s17 + $0x2f0] sm:$0xff] %v1192_v6  ;;  %1449 = vst [vmem:[%s2647_s17 + $0x2f8] sm:$0xff] %v1193_v8  ;;  %v804_v21 = vpop.xlane.xlu0 %803  ;;  %v1198_v30 = vmul.f32 %v1992_v29, %v1817_v25  ;;  %v1199_v32 = vmul.f32 %v1993_v31, %v1817_v25  ;;  %v1200_v34 = vmul.f32 %v1994_v33, %v1817_v25  ;;  %v2008_v8 = vld [vmem:[%s2375_s30 + $0x3a0] sm:$0xff]  ;;  %v2009_v10 = vld [vmem:[%s2375_s30 + $0x3a8] sm:$0xff] }
 0x10d   : > { %1442 = vst [vmem:[%s2647_s17 + $0x2c0] sm:$0xff] %v1186_v14  ;;  %1443 = vst [vmem:[%s2647_s17 + $0x2c8] sm:$0xff] %v1187_v16  ;;  %v1000_v23 = vmax.f32 %v804_v21, 1e-24  ;;  %1828 = vrsqrt.f32 %v1001_v22  ;;  %v1819_v28 = vpop.eup %1818  ;;  %v1201_v36 = vmul.f32 %v1995_v35, %v1817_v25  ;;  %v2010_v12 = vld [vmem:[%s2375_s30 + $0x3b0] sm:$0xff]  ;;  %v2011_v14 = vld [vmem:[%s2375_s30 + $0x3b8] sm:$0xff] }
 0x10e   : > { %1444 = vst [vmem:[%s2647_s17 + $0x2d0] sm:$0xff] %v1188_v18  ;;  %1445 = vst [vmem:[%s2647_s17 + $0x2d8] sm:$0xff] %v1189_v20  ;;  %v819_v24 = vpop.xlane.xlu1 %818  ;;  %v1194_v38 = vmul.f32 %v1996_v37, %v1819_v28  ;;  %v1195_v40 = vmul.f32 %v1997_v39, %v1819_v28  ;;  %v1196_v42 = vmul.f32 %v1998_v41, %v1819_v28  ;;  %v2012_v17 = vld [vmem:[%s2375_s30 + $0x380] sm:$0xff]  ;;  %v2013_v19 = vld [vmem:[%s2375_s30 + $0x388] sm:$0xff] }
 0x10f   : > { %v1003_v26 = vmax.f32 %v819_v24, 1e-24  ;;  %v1197_v44 = vmul.f32 %v1999_v43, %v1819_v28  ;;  %1454 = vst [vmem:[%s2647_s17 + $0x320] sm:$0xff] %v1198_v30  ;;  %1455 = vst [vmem:[%s2647_s17 + $0x328] sm:$0xff] %v1199_v32  ;;  %1830 = vrsqrt.f32 %v1000_v23  ;;  %v1821_v49 = vpop.eup %1820  ;;  %v2014_v21 = vld [vmem:[%s2375_s30 + $0x390] sm:$0xff]  ;;  %v2015_v23 = vld [vmem:[%s2375_s30 + $0x398] sm:$0xff] }
 0x110   : > { %v814_v27 = vpop.xlane.xlu0 %813  ;;  %1456 = vst [vmem:[%s2647_s17 + $0x330] sm:$0xff] %v1200_v34  ;;  %1457 = vst [vmem:[%s2647_s17 + $0x338] sm:$0xff] %v1201_v36  ;;  %v1206_v51 = vmul.f32 %v2000_v50, %v1821_v49  ;;  %v1207_v53 = vmul.f32 %v2001_v52, %v1821_v49  ;;  %v1208_v55 = vmul.f32 %v2002_v54, %v1821_v49  ;;  %v2016_v25 = vld [vmem:[%s2375_s30 + $0x3e0] sm:$0xff]  ;;  %v2018_v29 = vld [vmem:[%s2375_s30 + $0x3f0] sm:$0xff] }
 0x111   : > { %v1002_v45 = vmax.f32 %v814_v27, 1e-24  ;;  %1450 = vst [vmem:[%s2647_s17 + $0x300] sm:$0xff] %v1194_v38  ;;  %1451 = vst [vmem:[%s2647_s17 + $0x308] sm:$0xff] %v1195_v40  ;;  %1832 = vrsqrt.f32 %v1003_v26  ;;  %v1209_v57 = vmul.f32 %v2003_v56, %v1821_v49  ;;  %v1823_v58 = vpop.eup %1822  ;;  %v2017_v27 = vld [vmem:[%s2375_s30 + $0x3e8] sm:$0xff]  ;;  %v2019_v31 = vld [vmem:[%s2375_s30 + $0x3f8] sm:$0xff] }
 0x112   : > { %v829_v46 = vpop.xlane.xlu1 %828  ;;  %1452 = vst [vmem:[%s2647_s17 + $0x310] sm:$0xff] %v1196_v42  ;;  %1453 = vst [vmem:[%s2647_s17 + $0x318] sm:$0xff] %v1197_v44  ;;  %v1202_v63 = vmul.f32 %v2004_v62, %v1823_v58  ;;  %v1203_v1 = vmul.f32 %v2005_v0, %v1823_v58  ;;  %v1204_v3 = vmul.f32 %v2006_v2, %v1823_v58  ;;  %v2020_v40 = vld [vmem:[%s2375_s30 + $0x3c0] sm:$0xff]  ;;  %v2021_v42 = vld [vmem:[%s2375_s30 + $0x3c8] sm:$0xff] }
 0x113   : > { %v1005_v47 = vmax.f32 %v829_v46, 1e-24  ;;  %1834 = vrsqrt.f32 %v1002_v45  ;;  %v1825_v61 = vpop.eup %1824  ;;  %1462 = vst [vmem:[%s2647_s17 + $0x360] sm:$0xff] %v1206_v51  ;;  %1463 = vst [vmem:[%s2647_s17 + $0x368] sm:$0xff] %v1207_v53  ;;  %v1205_v5 = vmul.f32 %v2007_v4, %v1823_v58  ;;  %v2022_v44 = vld [vmem:[%s2375_s30 + $0x3d0] sm:$0xff]  ;;  %v2023_v46 = vld [vmem:[%s2375_s30 + $0x3d8] sm:$0xff] }
 0x114   : > { %v2860_v48 = vpop.xlane.xlu0 %823  ;;  %1464 = vst [vmem:[%s2647_s17 + $0x370] sm:$0xff] %v1208_v55  ;;  %1465 = vst [vmem:[%s2647_s17 + $0x378] sm:$0xff] %v1209_v57  ;;  %v1214_v9 = vmul.f32 %v2008_v8, %v1825_v61  ;;  %v1215_v11 = vmul.f32 %v2009_v10, %v1825_v61  ;;  %v1216_v13 = vmul.f32 %v2010_v12, %v1825_v61  ;;  %v2024_v49 = vld [vmem:[%s2375_s30 + $0x420] sm:$0xff]  ;;  %v2025_v51 = vld [vmem:[%s2375_s30 + $0x428] sm:$0xff] }
 0x115   : > { %1836 = vrsqrt.f32 %v1005_v47  ;;  %v1004_v59 = vmax.f32 %v2860_v48, 1e-24  ;;  %v1827_v7 = vpop.eup %1826  ;;  %v1217_v15 = vmul.f32 %v2011_v14, %v1825_v61  ;;  %1458 = vst [vmem:[%s2647_s17 + $0x340] sm:$0xff] %v1202_v63  ;;  %1459 = vst [vmem:[%s2647_s17 + $0x348] sm:$0xff] %v1203_v1  ;;  %v2026_v53 = vld [vmem:[%s2375_s30 + $0x430] sm:$0xff]  ;;  %v2027_v55 = vld [vmem:[%s2375_s30 + $0x438] sm:$0xff] }
 0x116   : > { %v2867_v60 = vpop.xlane.xlu1 %838  ;;  %1460 = vst [vmem:[%s2647_s17 + $0x350] sm:$0xff] %v1204_v3  ;;  %1461 = vst [vmem:[%s2647_s17 + $0x358] sm:$0xff] %v1205_v5  ;;  %v1210_v18 = vmul.f32 %v2012_v17, %v1827_v7  ;;  %v1211_v20 = vmul.f32 %v2013_v19, %v1827_v7  ;;  %v1212_v22 = vmul.f32 %v2014_v21, %v1827_v7  ;;  %v2028_v58 = vld [vmem:[%s2375_s30 + $0x400] sm:$0xff]  ;;  %v2030_v62 = vld [vmem:[%s2375_s30 + $0x410] sm:$0xff] }
 0x117   : > { %v1829_v16 = vpop.eup %1828  ;;  %v1213_v24 = vmul.f32 %v2015_v23, %v1827_v7  ;;  %1470 = vst [vmem:[%s2647_s17 + $0x3a0] sm:$0xff] %v1214_v9  ;;  %1471 = vst [vmem:[%s2647_s17 + $0x3a8] sm:$0xff] %v1215_v11  ;;  %1838 = vrsqrt.f32 %v1004_v59  ;;  %v1007_v36 = vmax.f32 %v2867_v60, 1e-24  ;;  %v2029_v60 = vld [vmem:[%s2375_s30 + $0x408] sm:$0xff]  ;;  %v2031_v0 = vld [vmem:[%s2375_s30 + $0x418] sm:$0xff] }
 0x118   : > { %v2877_v6 = vpop.xlane.xlu0 %833  ;;  %1472 = vst [vmem:[%s2647_s17 + $0x3b0] sm:$0xff] %v1216_v13  ;;  %1473 = vst [vmem:[%s2647_s17 + $0x3b8] sm:$0xff] %v1217_v15  ;;  %v1222_v26 = vmul.f32 %v2016_v25, %v1829_v16  ;;  %v1223_v28 = vmul.f32 %v2017_v27, %v1829_v16  ;;  %v1224_v30 = vmul.f32 %v2018_v29, %v1829_v16  ;;  %v2033_v8 = vld [vmem:[%s2375_s30 + $0x468] sm:$0xff]  ;;  %v2034_v10 = vld [vmem:[%s2375_s30 + $0x470] sm:$0xff] }
 0x119   : > { %v1225_v32 = vmul.f32 %v2019_v31, %v1829_v16  ;;  %1466 = vst [vmem:[%s2647_s17 + $0x380] sm:$0xff] %v1210_v18  ;;  %1467 = vst [vmem:[%s2647_s17 + $0x388] sm:$0xff] %v1211_v20  ;;  %v1831_v35 = vpop.eup %1830  ;;  %v1006_v37 = vmax.f32 %v2877_v6, 1e-24  ;;  %1840 = vrsqrt.f32 %v1007_v36  ;;  %v2032_v6 = vld [vmem:[%s2375_s30 + $0x460] sm:$0xff]  ;;  %v2035_v12 = vld [vmem:[%s2375_s30 + $0x478] sm:$0xff] }
 0x11a   : > { %v2899_v33 = vpop.xlane.xlu1 %848  ;;  %1468 = vst [vmem:[%s2647_s17 + $0x390] sm:$0xff] %v1212_v22  ;;  %1469 = vst [vmem:[%s2647_s17 + $0x398] sm:$0xff] %v1213_v24  ;;  %v1218_v41 = vmul.f32 %v2020_v40, %v1831_v35  ;;  %v1219_v43 = vmul.f32 %v2021_v42, %v1831_v35  ;;  %v1220_v45 = vmul.f32 %v2022_v44, %v1831_v35  ;;  %v2036_v20 = vld [vmem:[%s2375_s30 + $0x440] sm:$0xff]  ;;  %v2037_v22 = vld [vmem:[%s2375_s30 + $0x448] sm:$0xff] }
 0x11b   : > { %1478 = vst [vmem:[%s2647_s17 + $0x3e0] sm:$0xff] %v1222_v26  ;;  %1479 = vst [vmem:[%s2647_s17 + $0x3e8] sm:$0xff] %v1223_v28  ;;  %v1009_v38 = vmax.f32 %v2899_v33, 1e-24  ;;  %v1833_v39 = vpop.eup %1832  ;;  %v1221_v47 = vmul.f32 %v2023_v46, %v1831_v35  ;;  %1842 = vrsqrt.f32 %v1006_v37  ;;  %v2038_v24 = vld [vmem:[%s2375_s30 + $0x450] sm:$0xff]  ;;  %v2039_v26 = vld [vmem:[%s2375_s30 + $0x458] sm:$0xff] }
 0x11c   : > { %v2905_v34 = vpop.xlane.xlu0 %843  ;;  %1480 = vst [vmem:[%s2647_s17 + $0x3f0] sm:$0xff] %v1224_v30  ;;  %1481 = vst [vmem:[%s2647_s17 + $0x3f8] sm:$0xff] %v1225_v32  ;;  %v1230_v50 = vmul.f32 %v2024_v49, %v1833_v39  ;;  %v1231_v52 = vmul.f32 %v2025_v51, %v1833_v39  ;;  %v1232_v54 = vmul.f32 %v2026_v53, %v1833_v39  ;;  %v2041_v36 = vld [vmem:[%s2375_s30 + $0x4a8] sm:$0xff]  ;;  %v2043_v40 = vld [vmem:[%s2375_s30 + $0x4b8] sm:$0xff] }
 0x11d   : > { %v1835_v48 = vpop.eup %1834  ;;  %v1233_v56 = vmul.f32 %v2027_v55, %v1833_v39  ;;  %1474 = vst [vmem:[%s2647_s17 + $0x3c0] sm:$0xff] %v1218_v41  ;;  %1475 = vst [vmem:[%s2647_s17 + $0x3c8] sm:$0xff] %v1219_v43  ;;  %v1008_v4 = vmax.f32 %v2905_v34, 1e-24  ;;  %1844 = vrsqrt.f32 %v1009_v38  ;;  %v2040_v34 = vld [vmem:[%s2375_s30 + $0x4a0] sm:$0xff]  ;;  %v2042_v38 = vld [vmem:[%s2375_s30 + $0x4b0] sm:$0xff] }
 0x11e   : > { %v859_v57 = vpop.xlane.xlu1 %858  ;;  %1476 = vst [vmem:[%s2647_s17 + $0x3d0] sm:$0xff] %v1220_v45  ;;  %1477 = vst [vmem:[%s2647_s17 + $0x3d8] sm:$0xff] %v1221_v47  ;;  %v1226_v59 = vmul.f32 %v2028_v58, %v1835_v48  ;;  %v1227_v61 = vmul.f32 %v2029_v60, %v1835_v48  ;;  %v1228_v63 = vmul.f32 %v2030_v62, %v1835_v48  ;;  %v2044_v46 = vld [vmem:[%s2375_s30 + $0x480] sm:$0xff] }
 0x11f   : > { %v1229_v1 = vmul.f32 %v2031_v0, %v1835_v48  ;;  %v1837_v3 = vpop.eup %1836  ;;  %1486 = vst [vmem:[%s2647_s17 + $0x420] sm:$0xff] %v1230_v50  ;;  %1487 = vst [vmem:[%s2647_s17 + $0x428] sm:$0xff] %v1231_v52  ;;  %v1011_v5 = vmax.f32 %v859_v57, 1e-24  ;;  %1846 = vrsqrt.f32 %v1008_v4  ;;  %v2045_v48 = vld [vmem:[%s2375_s30 + $0x488] sm:$0xff]  ;;  %v2046_v50 = vld [vmem:[%s2375_s30 + $0x490] sm:$0xff] }
 0x120   : > { %v854_v2 = vpop.xlane.xlu0 %853  ;;  %1488 = vst [vmem:[%s2647_s17 + $0x430] sm:$0xff] %v1232_v54  ;;  %1489 = vst [vmem:[%s2647_s17 + $0x438] sm:$0xff] %v1233_v56  ;;  %v1238_v7 = vmul.f32 %v2032_v6, %v1837_v3  ;;  %v1239_v9 = vmul.f32 %v2033_v8, %v1837_v3  ;;  %v1240_v11 = vmul.f32 %v2034_v10, %v1837_v3  ;;  %v2047_v52 = vld [vmem:[%s2375_s30 + $0x498] sm:$0xff]  ;;  %v2048_v55 = vld [vmem:[%s2375_s30 + $0x4e0] sm:$0xff] }
 0x121   : > { %1482 = vst [vmem:[%s2647_s17 + $0x400] sm:$0xff] %v1226_v59  ;;  %1483 = vst [vmem:[%s2647_s17 + $0x408] sm:$0xff] %v1227_v61  ;;  %v1241_v13 = vmul.f32 %v2035_v12, %v1837_v3  ;;  %v1010_v15 = vmax.f32 %v854_v2, 1e-24  ;;  %v1839_v18 = vpop.eup %1838  ;;  %1848 = vrsqrt.f32 %v1011_v5  ;;  %v2049_v57 = vld [vmem:[%s2375_s30 + $0x4e8] sm:$0xff]  ;;  %v2050_v59 = vld [vmem:[%s2375_s30 + $0x4f0] sm:$0xff] }
 0x122   : > { %1484 = vst [vmem:[%s2647_s17 + $0x410] sm:$0xff] %v1228_v63  ;;  %1485 = vst [vmem:[%s2647_s17 + $0x418] sm:$0xff] %v1229_v1  ;;  %v869_v14 = vpop.xlane.xlu1 %868  ;;  %v1234_v21 = vmul.f32 %v2036_v20, %v1839_v18  ;;  %v1235_v23 = vmul.f32 %v2037_v22, %v1839_v18  ;;  %v1236_v25 = vmul.f32 %v2038_v24, %v1839_v18  ;;  %v2051_v61 = vld [vmem:[%s2375_s30 + $0x4f8] sm:$0xff]  ;;  %v2052_v1 = vld [vmem:[%s2375_s30 + $0x4c0] sm:$0xff] }
 0x123   : > { %1494 = vst [vmem:[%s2647_s17 + $0x460] sm:$0xff] %v1238_v7  ;;  %1495 = vst [vmem:[%s2647_s17 + $0x468] sm:$0xff] %v1239_v9  ;;  %v1013_v17 = vmax.f32 %v869_v14, 1e-24  ;;  %v1237_v27 = vmul.f32 %v2039_v26, %v1839_v18  ;;  %1850 = vrsqrt.f32 %v1010_v15  ;;  %v1841_v32 = vpop.eup %1840  ;;  %v2053_v3 = vld [vmem:[%s2375_s30 + $0x4c8] sm:$0xff]  ;;  %v2054_v5 = vld [vmem:[%s2375_s30 + $0x4d0] sm:$0xff] }
 0x124   : > { %1496 = vst [vmem:[%s2647_s17 + $0x470] sm:$0xff] %v1240_v11  ;;  %1497 = vst [vmem:[%s2647_s17 + $0x478] sm:$0xff] %v1241_v13  ;;  %v864_v16 = vpop.xlane.xlu0 %863  ;;  %v1246_v35 = vmul.f32 %v2040_v34, %v1841_v32  ;;  %v1247_v37 = vmul.f32 %v2041_v36, %v1841_v32  ;;  %v1248_v39 = vmul.f32 %v2042_v38, %v1841_v32  ;;  %v2055_v7 = vld [vmem:[%s2375_s30 + $0x4d8] sm:$0xff]  ;;  %v2056_v10 = vld [vmem:[%s2375_s30 + $0x520] sm:$0xff] }
 0x125   : > { %v1012_v19 = vmax.f32 %v864_v16, 1e-24  ;;  %1490 = vst [vmem:[%s2647_s17 + $0x440] sm:$0xff] %v1234_v21  ;;  %1491 = vst [vmem:[%s2647_s17 + $0x448] sm:$0xff] %v1235_v23  ;;  %1852 = vrsqrt.f32 %v1013_v17  ;;  %v1249_v41 = vmul.f32 %v2043_v40, %v1841_v32  ;;  %v1843_v43 = vpop.eup %1842  ;;  %v2057_v12 = vld [vmem:[%s2375_s30 + $0x528] sm:$0xff]  ;;  %v2058_v14 = vld [vmem:[%s2375_s30 + $0x530] sm:$0xff] }
 0x126   : > { %v879_v28 = vpop.xlane.xlu1 %878  ;;  %1492 = vst [vmem:[%s2647_s17 + $0x450] sm:$0xff] %v1236_v25  ;;  %1493 = vst [vmem:[%s2647_s17 + $0x458] sm:$0xff] %v1237_v27  ;;  %v1242_v47 = vmul.f32 %v2044_v46, %v1843_v43  ;;  %v1243_v49 = vmul.f32 %v2045_v48, %v1843_v43  ;;  %v1244_v51 = vmul.f32 %v2046_v50, %v1843_v43  ;;  %v2059_v16 = vld [vmem:[%s2375_s30 + $0x538] sm:$0xff]  ;;  %v2060_v23 = vld [vmem:[%s2375_s30 + $0x500] sm:$0xff] }
 0x127   : > { %v1015_v29 = vmax.f32 %v879_v28, 1e-24  ;;  %1854 = vrsqrt.f32 %v1012_v19  ;;  %v1845_v45 = vpop.eup %1844  ;;  %1502 = vst [vmem:[%s2647_s17 + $0x4a0] sm:$0xff] %v1246_v35  ;;  %1503 = vst [vmem:[%s2647_s17 + $0x4a8] sm:$0xff] %v1247_v37  ;;  %v1245_v53 = vmul.f32 %v2047_v52, %v1843_v43  ;;  %v2061_v25 = vld [vmem:[%s2375_s30 + $0x508] sm:$0xff]  ;;  %v2062_v27 = vld [vmem:[%s2375_s30 + $0x510] sm:$0xff] }
 0x128   : > { %v874_v30 = vpop.xlane.xlu0 %873  ;;  %1504 = vst [vmem:[%s2647_s17 + $0x4b0] sm:$0xff] %v1248_v39  ;;  %1505 = vst [vmem:[%s2647_s17 + $0x4b8] sm:$0xff] %v1249_v41  ;;  %v1254_v56 = vmul.f32 %v2048_v55, %v1845_v45  ;;  %v1255_v58 = vmul.f32 %v2049_v57, %v1845_v45  ;;  %v1256_v60 = vmul.f32 %v2050_v59, %v1845_v45  ;;  %v2065_v35 = vld [vmem:[%s2375_s30 + $0x568] sm:$0xff]  ;;  %v2066_v37 = vld [vmem:[%s2375_s30 + $0x570] sm:$0xff] }
 0x129   : > { %v1014_v31 = vmax.f32 %v874_v30, 1e-24  ;;  %1856 = vrsqrt.f32 %v1015_v29  ;;  %v1847_v54 = vpop.eup %1846  ;;  %v1257_v62 = vmul.f32 %v2051_v61, %v1845_v45  ;;  %1498 = vst [vmem:[%s2647_s17 + $0x480] sm:$0xff] %v1242_v47  ;;  %1499 = vst [vmem:[%s2647_s17 + $0x488] sm:$0xff] %v1243_v49  ;;  %v2063_v29 = vld [vmem:[%s2375_s30 + $0x518] sm:$0xff]  ;;  %v2068_v43 = vld [vmem:[%s2375_s30 + $0x540] sm:$0xff] }
 0x12a   : > { %v2955_v33 = vpop.xlane.xlu1 %888  ;;  %1500 = vst [vmem:[%s2647_s17 + $0x490] sm:$0xff] %v1244_v51  ;;  %1501 = vst [vmem:[%s2647_s17 + $0x498] sm:$0xff] %v1245_v53  ;;  %v1250_v2 = vmul.f32 %v2052_v1, %v1847_v54  ;;  %v1251_v4 = vmul.f32 %v2053_v3, %v1847_v54  ;;  %v1252_v6 = vmul.f32 %v2054_v5, %v1847_v54  ;;  %v2067_v39 = vld [vmem:[%s2375_s30 + $0x578] sm:$0xff]  ;;  %v2069_v45 = vld [vmem:[%s2375_s30 + $0x548] sm:$0xff] }
 0x12b   : > { %1858 = vrsqrt.f32 %v1014_v31  ;;  %v1017_v44 = vmax.f32 %v2955_v33, 1e-24  ;;  %v1849_v0 = vpop.eup %1848  ;;  %v1253_v8 = vmul.f32 %v2055_v7, %v1847_v54  ;;  %1510 = vst [vmem:[%s2647_s17 + $0x4e0] sm:$0xff] %v1254_v56  ;;  %1511 = vst [vmem:[%s2647_s17 + $0x4e8] sm:$0xff] %v1255_v58  ;;  %v2064_v33 = vld [vmem:[%s2375_s30 + $0x560] sm:$0xff]  ;;  %v2070_v47 = vld [vmem:[%s2375_s30 + $0x550] sm:$0xff] }
 0x12c   : > { %v2961_v42 = vpop.xlane.xlu0 %883  ;;  %1512 = vst [vmem:[%s2647_s17 + $0x4f0] sm:$0xff] %v1256_v60  ;;  %1513 = vst [vmem:[%s2647_s17 + $0x4f8] sm:$0xff] %v1257_v62  ;;  %v1262_v11 = vmul.f32 %v2056_v10, %v1849_v0  ;;  %v1263_v13 = vmul.f32 %v2057_v12, %v1849_v0  ;;  %v1264_v15 = vmul.f32 %v2058_v14, %v1849_v0  ;;  %v2071_v49 = vld [vmem:[%s2375_s30 + $0x558] sm:$0xff]  ;;  %v2072_v51 = vld [vmem:[%s2375_s30 + $0x5a0] sm:$0xff] }
 0x12d   : > { %v1265_v17 = vmul.f32 %v2059_v16, %v1849_v0  ;;  %v1851_v18 = vpop.eup %1850  ;;  %1506 = vst [vmem:[%s2647_s17 + $0x4c0] sm:$0xff] %v1250_v2  ;;  %1507 = vst [vmem:[%s2647_s17 + $0x4c8] sm:$0xff] %v1251_v4  ;;  %1860 = vrsqrt.f32 %v1017_v44  ;;  %v1016_v19 = vmax.f32 %v2961_v42, 1e-24  ;;  %v2073_v53 = vld [vmem:[%s2375_s30 + $0x5a8] sm:$0xff]  ;;  %v2074_v55 = vld [vmem:[%s2375_s30 + $0x5b0] sm:$0xff] }
 0x12e   : > { %v2976_v63 = vpop.xlane.xlu1 %898  ;;  %1508 = vst [vmem:[%s2647_s17 + $0x4d0] sm:$0xff] %v1252_v6  ;;  %1509 = vst [vmem:[%s2647_s17 + $0x4d8] sm:$0xff] %v1253_v8  ;;  %v1258_v24 = vmul.f32 %v2060_v23, %v1851_v18  ;;  %v1259_v26 = vmul.f32 %v2061_v25, %v1851_v18  ;;  %v1260_v28 = vmul.f32 %v2062_v27, %v1851_v18  ;;  %v2075_v57 = vld [vmem:[%s2375_s30 + $0x5b8] sm:$0xff]  ;;  %v2076_v0 = vld [vmem:[%s2375_s30 + $0x580] sm:$0xff] }
 0x12f   : > { %v1019_v20 = vmax.f32 %v2976_v63, 1e-24  ;;  %v1853_v22 = vpop.eup %1852  ;;  %1518 = vst [vmem:[%s2647_s17 + $0x520] sm:$0xff] %v1262_v11  ;;  %1519 = vst [vmem:[%s2647_s17 + $0x528] sm:$0xff] %v1263_v13  ;;  %v1261_v30 = vmul.f32 %v2063_v29, %v1851_v18  ;;  %1862 = vrsqrt.f32 %v1016_v19  ;;  %v2077_v2 = vld [vmem:[%s2375_s30 + $0x588] sm:$0xff]  ;;  %v2078_v4 = vld [vmem:[%s2375_s30 + $0x590] sm:$0xff] }
 0x130   : > { %v2986_v9 = vpop.xlane.xlu0 %893  ;;  %1520 = vst [vmem:[%s2647_s17 + $0x530] sm:$0xff] %v1264_v15  ;;  %1521 = vst [vmem:[%s2647_s17 + $0x538] sm:$0xff] %v1265_v17  ;;  %v1270_v34 = vmul.f32 %v2064_v33, %v1853_v22  ;;  %v1271_v36 = vmul.f32 %v2065_v35, %v1853_v22  ;;  %v1272_v38 = vmul.f32 %v2066_v37, %v1853_v22  ;;  %v2079_v6 = vld [vmem:[%s2375_s30 + $0x598] sm:$0xff]  ;;  %v2080_v15 = vld [vmem:[%s2375_s30 + $0x5e0] sm:$0xff] }
 0x131   : > { %v1018_v21 = vmax.f32 %v2986_v9, 1e-24  ;;  %v1855_v32 = vpop.eup %1854  ;;  %v1273_v40 = vmul.f32 %v2067_v39, %v1853_v22  ;;  %1514 = vst [vmem:[%s2647_s17 + $0x500] sm:$0xff] %v1258_v24  ;;  %1515 = vst [vmem:[%s2647_s17 + $0x508] sm:$0xff] %v1259_v26  ;;  %1864 = vrsqrt.f32 %v1019_v20  ;;  %v2081_v17 = vld [vmem:[%s2375_s30 + $0x5e8] sm:$0xff]  ;;  %v2082_v19 = vld [vmem:[%s2375_s30 + $0x5f0] sm:$0xff] }
 0x132   : > { %v3011_v31 = vpop.xlane.xlu1 %908  ;;  %1516 = vst [vmem:[%s2647_s17 + $0x510] sm:$0xff] %v1260_v28  ;;  %1517 = vst [vmem:[%s2647_s17 + $0x518] sm:$0xff] %v1261_v30  ;;  %v1266_v44 = vmul.f32 %v2068_v43, %v1855_v32  ;;  %v1267_v46 = vmul.f32 %v2069_v45, %v1855_v32  ;;  %v1268_v48 = vmul.f32 %v2070_v47, %v1855_v32  ;;  %v2083_v20 = vld [vmem:[%s2375_s30 + $0x5f8] sm:$0xff]  ;;  %v2084_v27 = vld [vmem:[%s2375_s30 + $0x5c0] sm:$0xff] }
 0x133   : > { %v1857_v42 = vpop.eup %1856  ;;  %v1269_v50 = vmul.f32 %v2071_v49, %v1855_v32  ;;  %1526 = vst [vmem:[%s2647_s17 + $0x560] sm:$0xff] %v1270_v34  ;;  %1527 = vst [vmem:[%s2647_s17 + $0x568] sm:$0xff] %v1271_v36  ;;  %v1021_v60 = vmax.f32 %v3011_v31, 1e-24  ;;  %1866 = vrsqrt.f32 %v1018_v21  ;;  %v2085_v29 = vld [vmem:[%s2375_s30 + $0x5c8] sm:$0xff]  ;;  %v2086_v31 = vld [vmem:[%s2375_s30 + $0x5d0] sm:$0xff] }
 0x134   : > { %v904_v41 = vpop.xlane.xlu0 %903  ;;  %1528 = vst [vmem:[%s2647_s17 + $0x570] sm:$0xff] %v1272_v38  ;;  %1529 = vst [vmem:[%s2647_s17 + $0x578] sm:$0xff] %v1273_v40  ;;  %v1278_v52 = vmul.f32 %v2072_v51, %v1857_v42  ;;  %v1279_v54 = vmul.f32 %v2073_v53, %v1857_v42  ;;  %v1280_v56 = vmul.f32 %v2074_v55, %v1857_v42  ;;  %v2087_v33 = vld [vmem:[%s2375_s30 + $0x5d8] sm:$0xff]  ;;  %v2088_v39 = vld [vmem:[%s2375_s30 + $0x620] sm:$0xff] }
 0x135   : > { %v1281_v58 = vmul.f32 %v2075_v57, %v1857_v42  ;;  %v1859_v59 = vpop.eup %1858  ;;  %1522 = vst [vmem:[%s2647_s17 + $0x540] sm:$0xff] %v1266_v44  ;;  %1523 = vst [vmem:[%s2647_s17 + $0x548] sm:$0xff] %v1267_v46  ;;  %v1020_v61 = vmax.f32 %v904_v41, 1e-24  ;;  %1868 = vrsqrt.f32 %v1021_v60  ;;  %v2089_v41 = vld [vmem:[%s2375_s30 + $0x628] sm:$0xff]  ;;  %v2090_v43 = vld [vmem:[%s2375_s30 + $0x630] sm:$0xff] }
 0x136   : > { %1524 = vst [vmem:[%s2647_s17 + $0x550] sm:$0xff] %v1268_v48  ;;  %1525 = vst [vmem:[%s2647_s17 + $0x558] sm:$0xff] %v1269_v50  ;;  %v919_v62 = vpop.xlane.xlu1 %918  ;;  %v1274_v1 = vmul.f32 %v2076_v0, %v1859_v59  ;;  %v1275_v3 = vmul.f32 %v2077_v2, %v1859_v59  ;;  %v1276_v5 = vmul.f32 %v2078_v4, %v1859_v59  ;;  %v2091_v45 = vld [vmem:[%s2375_s30 + $0x638] sm:$0xff]  ;;  %v2092_v49 = vld [vmem:[%s2375_s30 + $0x600] sm:$0xff] }
 0x137   : > { %1534 = vst [vmem:[%s2647_s17 + $0x5a0] sm:$0xff] %v1278_v52  ;;  %1535 = vst [vmem:[%s2647_s17 + $0x5a8] sm:$0xff] %v1279_v54  ;;  %v1277_v7 = vmul.f32 %v2079_v6, %v1859_v59  ;;  %v1023_v10 = vmax.f32 %v919_v62, 1e-24  ;;  %v1861_v13 = vpop.eup %1860  ;;  %1870 = vrsqrt.f32 %v1020_v61  ;;  %v2093_v51 = vld [vmem:[%s2375_s30 + $0x608] sm:$0xff]  ;;  %v2094_v53 = vld [vmem:[%s2375_s30 + $0x610] sm:$0xff] }
 0x138   : > { %1536 = vst [vmem:[%s2647_s17 + $0x5b0] sm:$0xff] %v1280_v56  ;;  %1537 = vst [vmem:[%s2647_s17 + $0x5b8] sm:$0xff] %v1281_v58  ;;  %v914_v8 = vpop.xlane.xlu0 %913  ;;  %v1286_v16 = vmul.f32 %v2080_v15, %v1861_v13  ;;  %v1287_v18 = vmul.f32 %v2081_v17, %v1861_v13  ;;  %v1288_v9 = vmul.f32 %v2082_v19, %v1861_v13  ;;  %v2095_v55 = vld [vmem:[%s2375_s30 + $0x618] sm:$0xff]  ;;  %v2096_v58 = vld [vmem:[%s2375_s30 + $0x660] sm:$0xff] }
 0x139   : > { %1530 = vst [vmem:[%s2647_s17 + $0x580] sm:$0xff] %v1274_v1  ;;  %1531 = vst [vmem:[%s2647_s17 + $0x588] sm:$0xff] %v1275_v3  ;;  %v1022_v11 = vmax.f32 %v914_v8, 1e-24  ;;  %v1289_v21 = vmul.f32 %v2083_v20, %v1861_v13  ;;  %1872 = vrsqrt.f32 %v1023_v10  ;;  %v1863_v26 = vpop.eup %1862  ;;  %v2097_v60 = vld [vmem:[%s2375_s30 + $0x668] sm:$0xff]  ;;  %v2098_v62 = vld [vmem:[%s2375_s30 + $0x670] sm:$0xff] }
 0x13a   : > { %1532 = vst [vmem:[%s2647_s17 + $0x590] sm:$0xff] %v1276_v5  ;;  %1533 = vst [vmem:[%s2647_s17 + $0x598] sm:$0xff] %v1277_v7  ;;  %v929_v12 = vpop.xlane.xlu1 %928  ;;  %v1282_v28 = vmul.f32 %v2084_v27, %v1863_v26  ;;  %v1283_v30 = vmul.f32 %v2085_v29, %v1863_v26  ;;  %v1284_v32 = vmul.f32 %v2086_v31, %v1863_v26  ;;  %v2099_v1 = vld [vmem:[%s2375_s30 + $0x678] sm:$0xff]  ;;  %v2100_v3 = vld [vmem:[%s2375_s30 + $0x640] sm:$0xff] }
 0x13b   : > { %v1025_v63 = vmax.f32 %v929_v12, 1e-24  ;;  %1542 = vst [vmem:[%s2647_s17 + $0x5e0] sm:$0xff] %v1286_v16  ;;  %1543 = vst [vmem:[%s2647_s17 + $0x5e8] sm:$0xff] %v1287_v18  ;;  %1874 = vrsqrt.f32 %v1022_v11  ;;  %v1285_v34 = vmul.f32 %v2087_v33, %v1863_v26  ;;  %v1865_v35 = vpop.eup %1864  ;;  %v2101_v5 = vld [vmem:[%s2375_s30 + $0x648] sm:$0xff]  ;;  %v2102_v7 = vld [vmem:[%s2375_s30 + $0x650] sm:$0xff] }
 0x13c   : > { %v924_v14 = vpop.xlane.xlu0 %923  ;;  %1544 = vst [vmem:[%s2647_s17 + $0x5f0] sm:$0xff] %v1288_v9  ;;  %1545 = vst [vmem:[%s2647_s17 + $0x5f8] sm:$0xff] %v1289_v21  ;;  %v1294_v40 = vmul.f32 %v2088_v39, %v1865_v35  ;;  %v1295_v42 = vmul.f32 %v2089_v41, %v1865_v35  ;;  %v1296_v44 = vmul.f32 %v2090_v43, %v1865_v35  ;;  %v2103_v10 = vld [vmem:[%s2375_s30 + $0x658] sm:$0xff]  ;;  %v2104_v18 = vld [vmem:[%s2375_s30 + $0x6a0] sm:$0xff] }
 0x13d   : > { %v1024_v22 = vmax.f32 %v924_v14, 1e-24  ;;  %1876 = vrsqrt.f32 %v1025_v63  ;;  %v1867_v38 = vpop.eup %1866  ;;  %1538 = vst [vmem:[%s2647_s17 + $0x5c0] sm:$0xff] %v1282_v28  ;;  %1539 = vst [vmem:[%s2647_s17 + $0x5c8] sm:$0xff] %v1283_v30  ;;  %v1297_v46 = vmul.f32 %v2091_v45, %v1865_v35  ;;  %v2105_v9 = vld [vmem:[%s2375_s30 + $0x6a8] sm:$0xff]  ;;  %v2106_v21 = vld [vmem:[%s2375_s30 + $0x6b0] sm:$0xff] }
 0x13e   : > { %v939_v23 = vpop.xlane.xlu1 %938  ;;  %1540 = vst [vmem:[%s2647_s17 + $0x5d0] sm:$0xff] %v1284_v32  ;;  %1541 = vst [vmem:[%s2647_s17 + $0x5d8] sm:$0xff] %v1285_v34  ;;  %v1290_v50 = vmul.f32 %v2092_v49, %v1867_v38  ;;  %v1291_v52 = vmul.f32 %v2093_v51, %v1867_v38  ;;  %v1292_v54 = vmul.f32 %v2094_v53, %v1867_v38  ;;  %v2108_v26 = vld [vmem:[%s2375_s30 + $0x680] sm:$0xff]  ;;  %v2109_v28 = vld [vmem:[%s2375_s30 + $0x688] sm:$0xff] }
 0x13f   : > { %v1027_v24 = vmax.f32 %v939_v23, 1e-24  ;;  %1878 = vrsqrt.f32 %v1024_v22  ;;  %v1869_v48 = vpop.eup %1868  ;;  %v1293_v56 = vmul.f32 %v2095_v55, %v1867_v38  ;;  %1550 = vst [vmem:[%s2647_s17 + $0x620] sm:$0xff] %v1294_v40  ;;  %1551 = vst [vmem:[%s2647_s17 + $0x628] sm:$0xff] %v1295_v42  ;;  %v2107_v23 = vld [vmem:[%s2375_s30 + $0x6b8] sm:$0xff]  ;;  %v2110_v30 = vld [vmem:[%s2375_s30 + $0x690] sm:$0xff] }
 0x140   : > { %v3062_v25 = vpop.xlane.xlu0 %933  ;;  %1552 = vst [vmem:[%s2647_s17 + $0x630] sm:$0xff] %v1296_v44  ;;  %1553 = vst [vmem:[%s2647_s17 + $0x638] sm:$0xff] %v1297_v46  ;;  %v1302_v59 = vmul.f32 %v2096_v58, %v1869_v48  ;;  %v1303_v61 = vmul.f32 %v2097_v60, %v1869_v48  ;;  %v1304_v0 = vmul.f32 %v2098_v62, %v1869_v48  ;;  %v2111_v32 = vld [vmem:[%s2375_s30 + $0x698] sm:$0xff]  ;;  %v2112_v35 = vld [vmem:[%s2375_s30 + $0x6e0] sm:$0xff] }
 0x141   : > { %1880 = vrsqrt.f32 %v1027_v24  ;;  %v1026_v36 = vmax.f32 %v3062_v25, 1e-24  ;;  %v1871_v57 = vpop.eup %1870  ;;  %v1305_v2 = vmul.f32 %v2099_v1, %v1869_v48  ;;  %1546 = vst [vmem:[%s2647_s17 + $0x600] sm:$0xff] %v1290_v50  ;;  %1547 = vst [vmem:[%s2647_s17 + $0x608] sm:$0xff] %v1291_v52  ;;  %v2114_v39 = vld [vmem:[%s2375_s30 + $0x6f0] sm:$0xff]  ;;  %v2115_v41 = vld [vmem:[%s2375_s30 + $0x6f8] sm:$0xff] }
 0x142   : > { %v3069_v37 = vpop.xlane.xlu1 %948  ;;  %1548 = vst [vmem:[%s2647_s17 + $0x610] sm:$0xff] %v1292_v54  ;;  %1549 = vst [vmem:[%s2647_s17 + $0x618] sm:$0xff] %v1293_v56  ;;  %v1298_v4 = vmul.f32 %v2100_v3, %v1871_v57  ;;  %v1299_v6 = vmul.f32 %v2101_v5, %v1871_v57  ;;  %v1300_v8 = vmul.f32 %v2102_v7, %v1871_v57  ;;  %v2116_v44 = vld [vmem:[%s2375_s30 + $0x6c0] sm:$0xff]  ;;  %v2117_v46 = vld [vmem:[%s2375_s30 + $0x6c8] sm:$0xff] }
 0x143   : > { %v1301_v11 = vmul.f32 %v2103_v10, %v1871_v57  ;;  %v1873_v13 = vpop.eup %1872  ;;  %1558 = vst [vmem:[%s2647_s17 + $0x660] sm:$0xff] %v1302_v59  ;;  %1559 = vst [vmem:[%s2647_s17 + $0x668] sm:$0xff] %v1303_v61  ;;  %1882 = vrsqrt.f32 %v1026_v36  ;;  %v1029_v63 = vmax.f32 %v3069_v37, 1e-24  ;;  %v2113_v37 = vld [vmem:[%s2375_s30 + $0x6e8] sm:$0xff]  ;;  %v2118_v49 = vld [vmem:[%s2375_s30 + $0x6d0] sm:$0xff] }
 0x144   : > { %v3079_v47 = vpop.xlane.xlu0 %943  ;;  %1560 = vst [vmem:[%s2647_s17 + $0x670] sm:$0xff] %v1304_v0  ;;  %1561 = vst [vmem:[%s2647_s17 + $0x678] sm:$0xff] %v1305_v2  ;;  %v1310_v19 = vmul.f32 %v2104_v18, %v1873_v13  ;;  %v1311_v20 = vmul.f32 %v2105_v9, %v1873_v13  ;;  %v1312_v22 = vmul.f32 %v2106_v21, %v1873_v13  ;;  %v2119_v51 = vld [vmem:[%s2375_s30 + $0x6d8] sm:$0xff]  ;;  %v2120_v57 = vld [vmem:[%s2375_s30 + $0x720] sm:$0xff] }
 0x145   : > { %v1028_v14 = vmax.f32 %v3079_v47, 1e-24  ;;  %v1875_v17 = vpop.eup %1874  ;;  %1554 = vst [vmem:[%s2647_s17 + $0x640] sm:$0xff] %v1298_v4  ;;  %1555 = vst [vmem:[%s2647_s17 + $0x648] sm:$0xff] %v1299_v6  ;;  %v1313_v24 = vmul.f32 %v2107_v23, %v1873_v13  ;;  %1884 = vrsqrt.f32 %v1029_v63  ;;  %v2121_v59 = vld [vmem:[%s2375_s30 + $0x728] sm:$0xff]  ;;  %v2122_v61 = vld [vmem:[%s2375_s30 + $0x730] sm:$0xff] }
 0x146   : > { %v3101_v12 = vpop.xlane.xlu1 %958  ;;  %1556 = vst [vmem:[%s2647_s17 + $0x650] sm:$0xff] %v1300_v8  ;;  %1557 = vst [vmem:[%s2647_s17 + $0x658] sm:$0xff] %v1301_v11  ;;  %v1306_v27 = vmul.f32 %v2108_v26, %v1875_v17  ;;  %v1307_v29 = vmul.f32 %v2109_v28, %v1875_v17  ;;  %v1308_v31 = vmul.f32 %v2110_v30, %v1875_v17  ;;  %v2123_v0 = vld [vmem:[%s2375_s30 + $0x738] sm:$0xff]  ;;  %v2124_v4 = vld [vmem:[%s2375_s30 + $0x700] sm:$0xff] }
 0x147   : > { %v1031_v15 = vmax.f32 %v3101_v12, 1e-24  ;;  %v1877_v25 = vpop.eup %1876  ;;  %v1309_v33 = vmul.f32 %v2111_v32, %v1875_v17  ;;  %1566 = vst [vmem:[%s2647_s17 + $0x6a0] sm:$0xff] %v1310_v19  ;;  %1567 = vst [vmem:[%s2647_s17 + $0x6a8] sm:$0xff] %v1311_v20  ;;  %1886 = vrsqrt.f32 %v1028_v14  ;;  %v2125_v5 = vld [vmem:[%s2375_s30 + $0x708] sm:$0xff]  ;;  %v2126_v7 = vld [vmem:[%s2375_s30 + $0x710] sm:$0xff] }
 0x148   : > { %v3110_v16 = vpop.xlane.xlu0 %953  ;;  %1568 = vst [vmem:[%s2647_s17 + $0x6b0] sm:$0xff] %v1312_v22  ;;  %1569 = vst [vmem:[%s2647_s17 + $0x6b8] sm:$0xff] %v1313_v24  ;;  %v1318_v36 = vmul.f32 %v2112_v35, %v1877_v25  ;;  %v1319_v38 = vmul.f32 %v2113_v37, %v1877_v25  ;;  %v1320_v40 = vmul.f32 %v2114_v39, %v1877_v25  ;;  %v2127_v10 = vld [vmem:[%s2375_s30 + $0x718] sm:$0xff]  ;;  %v2128_v13 = vld [vmem:[%s2375_s30 + $0x760] sm:$0xff] }
 0x149   : > { %v1879_v34 = vpop.eup %1878  ;;  %v1321_v42 = vmul.f32 %v2115_v41, %v1877_v25  ;;  %1562 = vst [vmem:[%s2647_s17 + $0x680] sm:$0xff] %v1306_v27  ;;  %1563 = vst [vmem:[%s2647_s17 + $0x688] sm:$0xff] %v1307_v29  ;;  %v1030_v54 = vmax.f32 %v3110_v16, 1e-24  ;;  %1888 = vrsqrt.f32 %v1031_v15  ;;  %v2129_v14 = vld [vmem:[%s2375_s30 + $0x768] sm:$0xff]  ;;  %v2130_v16 = vld [vmem:[%s2375_s30 + $0x770] sm:$0xff] }
 0x14a   : > { %v969_v43 = vpop.xlane.xlu1 %968  ;;  %1564 = vst [vmem:[%s2647_s17 + $0x690] sm:$0xff] %v1308_v31  ;;  %1565 = vst [vmem:[%s2647_s17 + $0x698] sm:$0xff] %v1309_v33  ;;  %v1314_v45 = vmul.f32 %v2116_v44, %v1879_v34  ;;  %v1315_v48 = vmul.f32 %v2117_v46, %v1879_v34  ;;  %v1316_v50 = vmul.f32 %v2118_v49, %v1879_v34  ;;  %v2131_v18 = vld [vmem:[%s2375_s30 + $0x778] sm:$0xff]  ;;  %v2132_v21 = vld [vmem:[%s2375_s30 + $0x740] sm:$0xff] }
 0x14b   : > { %v1317_v52 = vmul.f32 %v2119_v51, %v1879_v34  ;;  %v1881_v53 = vpop.eup %1880  ;;  %1574 = vst [vmem:[%s2647_s17 + $0x6e0] sm:$0xff] %v1318_v36  ;;  %1575 = vst [vmem:[%s2647_s17 + $0x6e8] sm:$0xff] %v1319_v38  ;;  %v1033_v55 = vmax.f32 %v969_v43, 1e-24  ;;  %1890 = vrsqrt.f32 %v1030_v54  ;;  %v2133_v23 = vld [vmem:[%s2375_s30 + $0x748] sm:$0xff]  ;;  %v2134_v25 = vld [vmem:[%s2375_s30 + $0x750] sm:$0xff] }
 0x14c   : > { %1576 = vst [vmem:[%s2647_s17 + $0x6f0] sm:$0xff] %v1320_v40  ;;  %1577 = vst [vmem:[%s2647_s17 + $0x6f8] sm:$0xff] %v1321_v42  ;;  %v964_v56 = vpop.xlane.xlu0 %963  ;;  %v1326_v58 = vmul.f32 %v2120_v57, %v1881_v53  ;;  %v1327_v60 = vmul.f32 %v2121_v59, %v1881_v53  ;;  %v1328_v62 = vmul.f32 %v2122_v61, %v1881_v53  ;;  %v2135_v27 = vld [vmem:[%s2375_s30 + $0x758] sm:$0xff]  ;;  %v2136_v30 = vld [vmem:[%s2375_s30 + $0x7a0] sm:$0xff] }
 0x14d   : > { %1570 = vst [vmem:[%s2647_s17 + $0x6c0] sm:$0xff] %v1314_v45  ;;  %1571 = vst [vmem:[%s2647_s17 + $0x6c8] sm:$0xff] %v1315_v48  ;;  %v1329_v1 = vmul.f32 %v2123_v0, %v1881_v53  ;;  %v1032_v2 = vmax.f32 %v964_v56, 1e-24  ;;  %v1883_v3 = vpop.eup %1882  ;;  %1892 = vrsqrt.f32 %v1033_v55  ;;  %v2137_v32 = vld [vmem:[%s2375_s30 + $0x7a8] sm:$0xff]  ;;  %v2138_v34 = vld [vmem:[%s2375_s30 + $0x7b0] sm:$0xff] }
 0x14e   : > { %1572 = vst [vmem:[%s2647_s17 + $0x6d0] sm:$0xff] %v1316_v50  ;;  %1573 = vst [vmem:[%s2647_s17 + $0x6d8] sm:$0xff] %v1317_v52  ;;  %v1322_v47 = vmul.f32 %v2124_v4, %v1883_v3  ;;  %v1323_v6 = vmul.f32 %v2125_v5, %v1883_v3  ;;  %v1324_v8 = vmul.f32 %v2126_v7, %v1883_v3  ;;  %v2139_v36 = vld [vmem:[%s2375_s30 + $0x7b8] sm:$0xff]  ;;  %v2140_v39 = vld [vmem:[%s2375_s30 + $0x780] sm:$0xff] }
 0x14f   : > { %1582 = vst [vmem:[%s2647_s17 + $0x720] sm:$0xff] %v1326_v58  ;;  %1583 = vst [vmem:[%s2647_s17 + $0x728] sm:$0xff] %v1327_v60  ;;  %v1325_v11 = vmul.f32 %v2127_v10, %v1883_v3  ;;  %1894 = vrsqrt.f32 %v1032_v2  ;;  %v1885_v12 = vpop.eup %1884  ;;  %v2141_v41 = vld [vmem:[%s2375_s30 + $0x788] sm:$0xff]  ;;  %v2142_v43 = vld [vmem:[%s2375_s30 + $0x790] sm:$0xff] }
 0x150   : > { %1584 = vst [vmem:[%s2647_s17 + $0x730] sm:$0xff] %v1328_v62  ;;  %1585 = vst [vmem:[%s2647_s17 + $0x738] sm:$0xff] %v1329_v1  ;;  %v1334_v63 = vmul.f32 %v2128_v13, %v1885_v12  ;;  %v1335_v15 = vmul.f32 %v2129_v14, %v1885_v12  ;;  %v1336_v17 = vmul.f32 %v2130_v16, %v1885_v12  ;;  %v2143_v45 = vld [vmem:[%s2375_s30 + $0x798] sm:$0xff]  ;;  %v2144_v48 = vld [vmem:[%s2375_s30 + $0x7e0] sm:$0xff] }
 0x151   : > { %1578 = vst [vmem:[%s2647_s17 + $0x700] sm:$0xff] %v1322_v47  ;;  %1579 = vst [vmem:[%s2647_s17 + $0x708] sm:$0xff] %v1323_v6  ;;  %v1337_v19 = vmul.f32 %v2131_v18, %v1885_v12  ;;  %v1887_v9 = vpop.eup %1886  ;;  %v2145_v50 = vld [vmem:[%s2375_s30 + $0x7e8] sm:$0xff]  ;;  %v2146_v52 = vld [vmem:[%s2375_s30 + $0x7f0] sm:$0xff] }
 0x152   : > { %1580 = vst [vmem:[%s2647_s17 + $0x710] sm:$0xff] %v1324_v8  ;;  %1581 = vst [vmem:[%s2647_s17 + $0x718] sm:$0xff] %v1325_v11  ;;  %v1330_v22 = vmul.f32 %v2132_v21, %v1887_v9  ;;  %v1331_v24 = vmul.f32 %v2133_v23, %v1887_v9  ;;  %v1332_v26 = vmul.f32 %v2134_v25, %v1887_v9  ;;  %v2147_v54 = vld [vmem:[%s2375_s30 + $0x7f8] sm:$0xff]  ;;  %v2148_v57 = vld [vmem:[%s2375_s30 + $0x7c0] sm:$0xff] }
 0x153   : > { %v1889_v20 = vpop.eup %1888  ;;  %1590 = vst [vmem:[%s2647_s17 + $0x760] sm:$0xff] %v1334_v63  ;;  %1591 = vst [vmem:[%s2647_s17 + $0x768] sm:$0xff] %v1335_v15  ;;  %v1333_v28 = vmul.f32 %v2135_v27, %v1887_v9  ;;  %v2149_v59 = vld [vmem:[%s2375_s30 + $0x7c8] sm:$0xff]  ;;  %v2150_v61 = vld [vmem:[%s2375_s30 + $0x7d0] sm:$0xff] }
 0x154   : > { %1592 = vst [vmem:[%s2647_s17 + $0x770] sm:$0xff] %v1336_v17  ;;  %1593 = vst [vmem:[%s2647_s17 + $0x778] sm:$0xff] %v1337_v19  ;;  %v1342_v31 = vmul.f32 %v2136_v30, %v1889_v20  ;;  %v1343_v33 = vmul.f32 %v2137_v32, %v1889_v20  ;;  %v1344_v35 = vmul.f32 %v2138_v34, %v1889_v20  ;;  %v2151_v0 = vld [vmem:[%s2375_s30 + $0x7d8] sm:$0xff] }
 0x155   : > { %v1891_v29 = vpop.eup %1890  ;;  %v1345_v37 = vmul.f32 %v2139_v36, %v1889_v20  ;;  %1586 = vst [vmem:[%s2647_s17 + $0x740] sm:$0xff] %v1330_v22  ;;  %1587 = vst [vmem:[%s2647_s17 + $0x748] sm:$0xff] %v1331_v24 }
 0x156   : > { %1588 = vst [vmem:[%s2647_s17 + $0x750] sm:$0xff] %v1332_v26  ;;  %1589 = vst [vmem:[%s2647_s17 + $0x758] sm:$0xff] %v1333_v28  ;;  %v1338_v40 = vmul.f32 %v2140_v39, %v1891_v29  ;;  %v1339_v42 = vmul.f32 %v2141_v41, %v1891_v29  ;;  %v1340_v44 = vmul.f32 %v2142_v43, %v1891_v29 }
 0x157   : > { %v1893_v38 = vpop.eup %1892  ;;  %v1341_v46 = vmul.f32 %v2143_v45, %v1891_v29  ;;  %1598 = vst [vmem:[%s2647_s17 + $0x7a0] sm:$0xff] %v1342_v31  ;;  %1599 = vst [vmem:[%s2647_s17 + $0x7a8] sm:$0xff] %v1343_v33 }
 0x158   : > { %1600 = vst [vmem:[%s2647_s17 + $0x7b0] sm:$0xff] %v1344_v35  ;;  %1601 = vst [vmem:[%s2647_s17 + $0x7b8] sm:$0xff] %v1345_v37  ;;  %v1350_v49 = vmul.f32 %v2144_v48, %v1893_v38  ;;  %v1351_v51 = vmul.f32 %v2145_v50, %v1893_v38  ;;  %v1352_v53 = vmul.f32 %v2146_v52, %v1893_v38 }
 0x159   : > { %v1353_v55 = vmul.f32 %v2147_v54, %v1893_v38  ;;  %v1895_v56 = vpop.eup %1894  ;;  %1594 = vst [vmem:[%s2647_s17 + $0x780] sm:$0xff] %v1338_v40  ;;  %1595 = vst [vmem:[%s2647_s17 + $0x788] sm:$0xff] %v1339_v42 }
 0x15a   : > { %1596 = vst [vmem:[%s2647_s17 + $0x790] sm:$0xff] %v1340_v44  ;;  %1597 = vst [vmem:[%s2647_s17 + $0x798] sm:$0xff] %v1341_v46  ;;  %v1346_v58 = vmul.f32 %v2148_v57, %v1895_v56  ;;  %v1347_v60 = vmul.f32 %v2149_v59, %v1895_v56  ;;  %v1348_v62 = vmul.f32 %v2150_v61, %v1895_v56 }
 0x15b   : > { %1606 = vst [vmem:[%s2647_s17 + $0x7e0] sm:$0xff] %v1350_v49  ;;  %1607 = vst [vmem:[%s2647_s17 + $0x7e8] sm:$0xff] %v1351_v51  ;;  %v1349_v1 = vmul.f32 %v2151_v0, %v1895_v56 }
 0x15c   : > { %1608 = vst [vmem:[%s2647_s17 + $0x7f0] sm:$0xff] %v1352_v53  ;;  %1609 = vst [vmem:[%s2647_s17 + $0x7f8] sm:$0xff] %v1353_v55 }
 0x15d   : > { %1602 = vst [vmem:[%s2647_s17 + $0x7c0] sm:$0xff] %v1346_v58  ;;  %1603 = vst [vmem:[%s2647_s17 + $0x7c8] sm:$0xff] %v1347_v60 }
 0x15e   : > { %1604 = vst [vmem:[%s2647_s17 + $0x7d0] sm:$0xff] %v1348_v62  ;;  %1605 = vst [vmem:[%s2647_s17 + $0x7d8] sm:$0xff] %v1349_v1 }
 0x15f   : > { %2195 = shalt.err (!%p2192_p1)
}
 0x160   : > { %s2196_s13 = scalar_lea.hbm %s3212_s2, 32768  ;;  %s2200_s20 = scalar_lea.hbm %s3272_s1, 262144 }
 0x161   : > { %p2197_p3 = scmp.ne.s32.totalorder %s3212_s2, %s2196_s13  ;;  %p2201_p0 = scmp.lt.u32.totalorder %s3212_s2, %s3272_s1 }
 0x162   : > { %p2202_p2 = scmp.lt.u32.totalorder %s2200_s20, %s2196_s13  ;;  %p2204_p6 = scmp.lt.u32.totalorder %s2196_s13, %s3212_s2 }
 0x163   : > { %p2198_p4 = pnand %p2197_p3, %p3279_p10 }
 0x164   : > { %p2203_p7 = por %p2202_p2, %p2201_p0 }
 0x165   : > { %p2199_p5 = pneg %p2198_p4 }
 0x166   : > { %p2205_p11 = por %p2204_p6, %p2203_p7 }
 0x168   : > { %p2206_p12 = pnand %p2205_p11, %p2199_p5 }
 0x16a   : > { %2209 = shalt.err (!%p2206_p12)
}
 0x16b   : > { %s2254_s24 = smov 512   ;;  %s2255_s26 = smov 32  }
 0x16c   : > { %1720 = dma.vmem_to_hbm [thread:$0]  (%p3279_p10), %s3216_s27, 32768, %s3212_s2, %s1611_s10, %s2254_s24, %s2254_s24, %s2255_s26  }
 0x16d PF: > { %p1731_p8 = scmp.ge.s32.totalorder %s2248_s9, 2  ;;  %s1640_s30 = sand.u32 1, %s2236_s6  }
 0x16e   : > { %p3280_p9 = scmp.ne.s32.totalorder %s3277_s19, 0  ;;  %s1641_s17 = scalar_lea.sflag [#allocation4], %s1640_s30 }
 0x170   : > { %p1727_p13 = pnand %p1731_p8, %p3280_p9 }
 0x172   : > { %2231 = dma.done.wait (!%p1727_p13), %s1641_s17, 32768  }
 0x173   : > { %2233 = vsyncadd (!%p1727_p13), %s1641_s17, 4294934528  ;;  %p14_p1 = scmp.ge.s32.totalorder %s2291_s12, 10   ;;  %s3281_s6 = smov %s2240_s7 }
 0x174   : > { %s3282_s7 = smov %s2244_s8  ;;  %s3283_s8 = smov %s2303_s15 }
 0x175   : > { %s3284_s9 = smov %s2291_s12  ;;  %16 = sbr.rel (!%p14_p1) target bundleno = 5 (0x5), region = 69 }
 0x17c   :  { %1646 = vsyncpa [#allocation3], 1 }
 0x17d   :  { %1648 = vsyncpa [#allocation3 + $0x1], 1 }
 0x17e   :  { %1649 = vsyncpa [#allocation4], 1 }
 0x17f   :  { %1651 = vsyncpa [#allocation4 + $0x1], 1 }

</bundles_post_ra>
